<compile_context>
chip_gen: v6e
topology: v6e:2x2x1
jax: 0.10.0
libtpu: 0.0.40
codegen_flags: <defaults>
</compile_context>

<pallas_src>
import jax
import jax.numpy as jnp
from jax.experimental import pallas as pl
from jax.experimental.pallas import tpu as pltpu


def _round_up(x, m):
    return ((x + m - 1) // m) * m


def _pad2(a, rows, cols):
    r, c = a.shape
    return jnp.pad(a, ((0, rows - r), (0, cols - c)))


def _bert_classifier_kernel(
    # scalar-prefetch refs (SMEM)
    vlen_ref,
    # blocked VMEM inputs
    tok_ref, sid_ref,                   # (Bt, ts) int32 id tiles
    word_ref, seg_ref,                  # (Vp, Hp) / (Sg, Hp) bf16 tables (resident)
    wp_ref, bp_ref, wc_ref, bc_ref,     # pooler / classifier weights (resident)
    # output
    out_ref,                            # (Bt, CP) f32 logits block
    # scratch
    acc_ref,                            # (Bt, Hp) f32 masked-sum accumulator
):
    bb = pl.program_id(0)               # batch block ("parallel")
    st = pl.program_id(1)               # seq tile    ("arbitrary": reduction)
    num_st = pl.num_programs(1)
    Bt, ts = tok_ref.shape
    Vp = word_ref.shape[0]
    Sg = seg_ref.shape[0]

    vl0 = vlen_ref[0]                   # scalar read (SMEM) before any heavy work
    base = st * ts

    @pl.when(st == 0)
    def _init():
        acc_ref[...] = jnp.zeros_like(acc_ref)

    # gen_attention_mask early-return bug: only global batch row 0 is ever
    # unmasked, and only up to valid_length[0].  Skip every grid step that
    # cannot contribute -> removes ~(B-1)/B of all gather + matmul work.
    @pl.when(jnp.logical_and(bb == 0, base < vl0))
    def _accumulate():
        tok = tok_ref[...]
        sid = sid_ref[...]

        # Attention mask for this tile, generated from valid_length.
        pos = base + jax.lax.broadcasted_iota(jnp.int32, (Bt, ts), 1)
        row = bb * Bt + jax.lax.broadcasted_iota(jnp.int32, (Bt, ts), 0)
        live = jnp.logical_and(row == 0, pos < vl0)
        mask = jnp.where(live, 1.0, 0.0)                          # (Bt, ts) f32

        # Mask-weighted one-hot counts (lanes stay the seq axis: no relayout),
        # then masked-sum pooling rides the MXU as (Bt,Vp)@(Vp,Hp) and
        # (Bt,Sg)@(Sg,Hp) with M = Bt >= 8, f32 accumulation.
        v_iota = jax.lax.broadcasted_iota(jnp.int32, (Bt, Vp, ts), 1)
        w_hot = jnp.where(tok[:, None, :] == v_iota, mask[:, None, :], 0.0)
        wcounts = jnp.sum(w_hot, axis=2).astype(jnp.bfloat16)     # (Bt, Vp)

        s_iota = jax.lax.broadcasted_iota(jnp.int32, (Bt, Sg, ts), 1)
        s_hot = jnp.where(sid[:, None, :] == s_iota, mask[:, None, :], 0.0)
        scounts = jnp.sum(s_hot, axis=2).astype(jnp.bfloat16)     # (Bt, Sg)

        acc_ref[...] += jnp.dot(wcounts, word_ref[...],
                                preferred_element_type=jnp.float32)
        acc_ref[...] += jnp.dot(scounts, seg_ref[...],
                                preferred_element_type=jnp.float32)

    # finalize: mean, pooler dense+tanh, dropout(identity), classifier
    @pl.when(st == num_st - 1)
    def _finalize():
        row = bb * Bt + jax.lax.broadcasted_iota(jnp.int32, (Bt, 1), 0)
        cnt = jnp.where(row == 0, vl0, 0).astype(jnp.float32)
        denom = jnp.maximum(cnt, 1.0)          # documented deviation: avoids NaN
        pooled = acc_ref[...] * pl.reciprocal(denom, approx=True)  # (Bt, Hp) f32

        h = jnp.tanh(jnp.dot(pooled.astype(jnp.bfloat16), wp_ref[...],
                             preferred_element_type=jnp.float32) + bp_ref[...])

        # dropout (dr_rate set, eval mode) == identity
        logits = jnp.dot(h.astype(jnp.bfloat16), wc_ref[...],
                         preferred_element_type=jnp.float32) + bc_ref[...]
        out_ref[...] = logits                                      # (Bt, CP) lane-dense


def bert_classifier_forward(token_ids, valid_length, segment_ids, params, *,
                            bt=8, ts=128):
    """JAX/Pallas equivalent of BERTClassifier.forward (dr_rate set, eval)."""
    B, S = token_ids.shape
    V, H = params["word_emb"].shape
    C = params["wc"].shape[1]

    assert bt % 8 == 0, "batch tile must be a multiple of 8 sublanes"
    assert ts % 128 == 0, "sequence tile must be a multiple of 128 lanes"
    assert ts <= 256, "one-hot counts stay exact in bf16 only for ts <= 256"

    Bp = _round_up(max(B, bt), bt)
    Sp = _round_up(S, ts)
    num_bb = Bp // bt
    num_st = Sp // ts

    # Lane-dense padding: hidden / class / vocab dims rounded to 128 lanes.
    Hp = _round_up(max(H, 128), 128)
    CP = _round_up(max(C, 128), 128)
    Vp = _round_up(max(V, 128), 128)
    Sg = 8                                     # 2-row segment table -> one sublane tile

    # bf16 for the matmul operands; f32 accumulation inside the kernel.
    word_emb = _pad2(params["word_emb"], Vp, Hp).astype(jnp.bfloat16)
    seg_emb = _pad2(params["seg_emb"], Sg, Hp).astype(jnp.bfloat16)
    wp = _pad2(params["wp"], Hp, Hp).astype(jnp.bfloat16)
    bp = _pad2(params["bp"], 1, Hp).astype(jnp.float32)
    wc = _pad2(params["wc"], Hp, CP).astype(jnp.bfloat16)
    bc = _pad2(params["bc"], 1, CP).astype(jnp.float32)

    tok = jnp.pad(token_ids.astype(jnp.int32), ((0, Bp - B), (0, Sp - S)))
    sid = jnp.pad(segment_ids.astype(jnp.int32), ((0, Bp - B), (0, Sp - S)))
    vlen = jnp.minimum(valid_length.astype(jnp.int32), S)

    grid_spec = pltpu.PrefetchScalarGridSpec(
        num_scalar_prefetch=1,                  # valid_length
        grid=(num_bb, num_st),                  # (batch block, seq tile)
        in_specs=[
            pl.BlockSpec((bt, ts), lambda bb, st, vl: (bb, st)),   # token ids
            pl.BlockSpec((bt, ts), lambda bb, st, vl: (bb, st)),   # segment ids
            pl.BlockSpec((Vp, Hp), lambda bb, st, vl: (0, 0)),     # word table (resident)
            pl.BlockSpec((Sg, Hp), lambda bb, st, vl: (0, 0)),     # seg table (resident)
            pl.BlockSpec((Hp, Hp), lambda bb, st, vl: (0, 0)),     # wp (resident)
            pl.BlockSpec((1, Hp),  lambda bb, st, vl: (0, 0)),     # bp
            pl.BlockSpec((Hp, CP), lambda bb, st, vl: (0, 0)),     # wc
            pl.BlockSpec((1, CP),  lambda bb, st, vl: (0, 0)),     # bc
        ],
        out_specs=pl.BlockSpec((bt, CP), lambda bb, st, vl: (bb, 0)),
        scratch_shapes=[
            pltpu.VMEM((bt, Hp), jnp.float32),  # masked-sum accumulator
        ],
    )

    out = pl.pallas_call(
        _bert_classifier_kernel,
        out_shape=jax.ShapeDtypeStruct((Bp, CP), jnp.float32),
        grid_spec=grid_spec,
        compiler_params=pltpu.CompilerParams(
            # batch-block axis -> parallel (v7x megacore); seq axis -> reduction.
            dimension_semantics=("parallel", "arbitrary"),
            # Tiny footprint here; 32 MiB fits the scoped default on all gens
            # (v7x has only 64 MiB physical VMEM).
            vmem_limit_bytes=32 * 1024 * 1024,
        ),
    )(vlen, tok, sid, word_emb, seg_emb, wp, bp, wc, bc)

    return out[:B, :C]                          # drop batch / lane padding


def bert_classifier_reference(token_ids, valid_length, segment_ids, params):
    """Pure-JAX reference mirroring the kernel's bf16/f32 dtype handling."""
    B, S = token_ids.shape
    pos = jnp.arange(S)
    row0 = (pos < valid_length[0]).astype(jnp.float32)
    mask = jnp.zeros((B, S), jnp.float32).at[0].set(row0)        # the torch bug

    we = params["word_emb"].astype(jnp.bfloat16).astype(jnp.float32)
    se = params["seg_emb"].astype(jnp.bfloat16).astype(jnp.float32)
    word_sum = jnp.einsum("bs,bsh->bh", mask, we[token_ids])
    seg_sum = jnp.einsum("bs,bsh->bh", mask, se[segment_ids])

    denom = jnp.maximum(mask.sum(axis=1, keepdims=True), 1.0)
    pooled = (word_sum + seg_sum) / denom

    wp = params["wp"].astype(jnp.bfloat16).astype(jnp.float32)
    wc = params["wc"].astype(jnp.bfloat16).astype(jnp.float32)
    h = jnp.tanh(pooled.astype(jnp.bfloat16).astype(jnp.float32) @ wp + params["bp"])
    return h.astype(jnp.bfloat16).astype(jnp.float32) @ wc + params["bc"]


def init_params(key, vocab_size, hidden_size, num_classes):
    k1, k2, k3, k4 = jax.random.split(key, 4)
    scale = 0.02
    return {
        "word_emb": scale * jax.random.normal(k1, (vocab_size, hidden_size), jnp.float32),
        "seg_emb": scale * jax.random.normal(k2, (2, hidden_size), jnp.float32),
        "wp": scale * jax.random.normal(k3, (hidden_size, hidden_size), jnp.float32),
        "bp": jnp.zeros((1, hidden_size), jnp.float32),
        "wc": scale * jax.random.normal(k4, (hidden_size, num_classes), jnp.float32),
        "bc": jnp.zeros((1, num_classes), jnp.float32),
    }


if __name__ == "__main__":
    B, S, H, C, VOCAB = 2, 16, 32, 7, 50

    key = jax.random.PRNGKey(0)
    kp, kt, ks = jax.random.split(key, 3)

    params = init_params(kp, VOCAB, H, C)
    token_ids = jax.random.randint(kt, (B, S), 0, VOCAB, dtype=jnp.int32)
    segment_ids = jax.random.randint(ks, (B, S), 0, 2, dtype=jnp.int32)
    valid_length = jnp.array([9, 13], dtype=jnp.int32)

    logits = bert_classifier_forward(token_ids, valid_length, segment_ids, params)
    logits = jax.block_until_ready(logits)
    assert logits.shape == (B, C)
    assert bool(jnp.all(jnp.isfinite(logits)))

    ref = bert_classifier_reference(token_ids, valid_length, segment_ids, params)
    assert jnp.allclose(logits, ref, atol=1e-3, rtol=5e-2), (logits, ref)

    print("KERNEL_OK")
</pallas_src>

<mosaic_0001>
module attributes {stable_mosaic.version = 11 : i64} {
  func.func @_bert_classifier_kernel(%arg0: i32, %arg1: i32, %arg2: memref<2xi32, #tpu.memory_space<smem>>, %arg3: memref<8x128xi32, #tpu.memory_space<vmem>>, %arg4: memref<8x128xi32, #tpu.memory_space<vmem>>, %arg5: memref<128x128xbf16, #tpu.memory_space<vmem>>, %arg6: memref<8x128xbf16, #tpu.memory_space<vmem>>, %arg7: memref<128x128xbf16, #tpu.memory_space<vmem>>, %arg8: memref<1x128xf32, #tpu.memory_space<vmem>>, %arg9: memref<128x128xbf16, #tpu.memory_space<vmem>>, %arg10: memref<1x128xf32, #tpu.memory_space<vmem>>, %arg11: memref<8x128xf32, #tpu.memory_space<vmem>>, %arg12: memref<8x128xf32, #tpu.memory_space<vmem>>) attributes {dimension_semantics = [#tpu.dimension_semantics<parallel>, #tpu.dimension_semantics<arbitrary>], iteration_bounds = array<i64: 1, 1>, scalar_prefetch = 1 : i64, scratch_operands = 1 : i64, tpu.core_type = #tpu.core_type<tc>, window_params = [{transform_indices = @transform_0, window_bounds = array<i64: 8, 128>}, {transform_indices = @transform_1, window_bounds = array<i64: 8, 128>}, {pipeline_mode = #tpu.pipeline_mode<synchronous>, transform_indices = @transform_2, window_bounds = array<i64: 128, 128>}, {pipeline_mode = #tpu.pipeline_mode<synchronous>, transform_indices = @transform_3, window_bounds = array<i64: 8, 128>}, {pipeline_mode = #tpu.pipeline_mode<synchronous>, transform_indices = @transform_4, window_bounds = array<i64: 128, 128>}, {pipeline_mode = #tpu.pipeline_mode<synchronous>, transform_indices = @transform_5, window_bounds = array<i64: 1, 128>}, {pipeline_mode = #tpu.pipeline_mode<synchronous>, transform_indices = @transform_6, window_bounds = array<i64: 128, 128>}, {pipeline_mode = #tpu.pipeline_mode<synchronous>, transform_indices = @transform_7, window_bounds = array<i64: 1, 128>}, {transform_indices = @transform_8, window_bounds = array<i64: 8, 128>}]} {
    %c0 = arith.constant 0 : index
    %0 = memref.load %arg2[%c0] : memref<2xi32, #tpu.memory_space<smem>>
    %c128_i32 = arith.constant 128 : i32
    %1 = arith.muli %arg1, %c128_i32 : i32
    %c0_i32 = arith.constant 0 : i32
    %2 = arith.cmpi eq, %arg1, %c0_i32 : i32
    %3 = arith.extui %2 : i1 to i32
    %c0_i32_0 = arith.constant 0 : i32
    %4 = arith.cmpi ne, %3, %c0_i32_0 : i32
    scf.if %4 {
      %cst = arith.constant 0.000000e+00 : f32
      %13 = vector.broadcast %cst : f32 to vector<8x128xf32>
      %c0_5 = arith.constant 0 : index
      %c0_6 = arith.constant 0 : index
      %14 = vector.load %arg12[%c0_5, %c0_6] : memref<8x128xf32, #tpu.memory_space<vmem>>, vector<8x128xf32>
      tpu.vector_store %arg12[%c0_5, %c0_6], %13 {strides = array<i32>} : memref<8x128xf32, #tpu.memory_space<vmem>>, vector<8x128xf32>,
    } else {
    }
    %c0_i32_1 = arith.constant 0 : i32
    %5 = arith.cmpi eq, %arg0, %c0_i32_1 : i32
    %6 = arith.cmpi slt, %1, %0 : i32
    %7 = arith.andi %5, %6 : i1
    %8 = arith.extui %7 : i1 to i32
    %c0_i32_2 = arith.constant 0 : i32
    %9 = arith.cmpi ne, %8, %c0_i32_2 : i32
    scf.if %9 {
      %c0_5 = arith.constant 0 : index
      %c0_6 = arith.constant 0 : index
      %13 = vector.load %arg3[%c0_5, %c0_6] : memref<8x128xi32, #tpu.memory_space<vmem>>, vector<8x128xi32>
      %c0_7 = arith.constant 0 : index
      %c0_8 = arith.constant 0 : index
      %14 = vector.load %arg4[%c0_7, %c0_8] : memref<8x128xi32, #tpu.memory_space<vmem>>, vector<8x128xi32>
      %15 = tpu.iota {dimensions = array<i32: 1>} : vector<8x128xi32>
      %16 = vector.broadcast %1 : i32 to vector<8x128xi32>
      %17 = arith.addi %16, %15 : vector<8x128xi32>
      %c8_i32 = arith.constant 8 : i32
      %18 = arith.muli %arg0, %c8_i32 : i32
      %19 = tpu.iota {dimensions = array<i32: 0>} : vector<8x128xi32>
      %20 = vector.broadcast %18 : i32 to vector<8x128xi32>
      %21 = arith.addi %20, %19 : vector<8x128xi32>
      %c0_i32_9 = arith.constant 0 : i32
      %22 = vector.broadcast %c0_i32_9 : i32 to vector<8x128xi32>
      %23 = arith.cmpi eq, %21, %22 : vector<8x128xi32>
      %24 = vector.broadcast %0 : i32 to vector<8x128xi32>
      %25 = arith.cmpi slt, %17, %24 : vector<8x128xi32>
      %26 = arith.andi %23, %25 : vector<8x128xi1>
      %cst = arith.constant 1.000000e+00 : f32
      %cst_10 = arith.constant 0.000000e+00 : f32
      %27 = vector.broadcast %cst : f32 to vector<8x128xf32>
      %28 = vector.broadcast %cst_10 : f32 to vector<8x128xf32>
      %29 = arith.select %26, %27, %28 : vector<8x128xi1>, vector<8x128xf32>
      %30 = tpu.iota {dimensions = array<i32: 1>} : vector<8x128x128xi32>
      %31 = vector.shape_cast %13 : vector<8x128xi32> to vector<8x1x128xi32>
      %32 = vector.broadcast %31 : vector<8x1x128xi32> to vector<8x128x128xi32>
      %33 = arith.cmpi eq, %32, %30 : vector<8x128x128xi32>
      %34 = vector.shape_cast %29 : vector<8x128xf32> to vector<8x1x128xf32>
      %cst_11 = arith.constant 0.000000e+00 : f32
      %35 = vector.shape_cast %34 : vector<8x1x128xf32> to vector<8x1x128xf32>
      %36 = vector.broadcast %35 : vector<8x1x128xf32> to vector<8x128x128xf32>
      %37 = vector.broadcast %cst_11 : f32 to vector<8x128x128xf32>
      %38 = arith.select %33, %36, %37 : vector<8x128x128xi1>, vector<8x128x128xf32>
      %cst_12 = arith.constant dense<0.000000e+00> : vector<8x128xf32>
      %39 = vector.multi_reduction <add>, %38, %cst_12 [2] : vector<8x128x128xf32> to vector<8x128xf32>
      %40 = arith.truncf %39 : vector<8x128xf32> to vector<8x128xbf16>
      %41 = tpu.iota {dimensions = array<i32: 1>} : vector<8x8x128xi32>
      %42 = vector.shape_cast %14 : vector<8x128xi32> to vector<8x1x128xi32>
      %43 = vector.broadcast %42 : vector<8x1x128xi32> to vector<8x8x128xi32>
      %44 = arith.cmpi eq, %43, %41 : vector<8x8x128xi32>
      %45 = vector.shape_cast %29 : vector<8x128xf32> to vector<8x1x128xf32>
      %cst_13 = arith.constant 0.000000e+00 : f32
      %46 = vector.shape_cast %45 : vector<8x1x128xf32> to vector<8x1x128xf32>
      %47 = vector.broadcast %46 : vector<8x1x128xf32> to vector<8x8x128xf32>
      %48 = vector.broadcast %cst_13 : f32 to vector<8x8x128xf32>
      %49 = arith.select %44, %47, %48 : vector<8x8x128xi1>, vector<8x8x128xf32>
      %cst_14 = arith.constant dense<0.000000e+00> : vector<8x8xf32>
      %50 = vector.multi_reduction <add>, %49, %cst_14 [2] : vector<8x8x128xf32> to vector<8x8xf32>
      %51 = arith.truncf %50 : vector<8x8xf32> to vector<8x8xbf16>
      %c0_15 = arith.constant 0 : index
      %c0_16 = arith.constant 0 : index
      %52 = vector.load %arg12[%c0_15, %c0_16] : memref<8x128xf32, #tpu.memory_space<vmem>>, vector<8x128xf32>
      %c0_17 = arith.constant 0 : index
      %c0_18 = arith.constant 0 : index
      %53 = vector.load %arg5[%c0_17, %c0_18] : memref<128x128xbf16, #tpu.memory_space<vmem>>, vector<128x128xbf16>
      %cst_19 = arith.constant dense<0.000000e+00> : vector<8x128xf32>
      %54 = tpu.matmul %40, %53, %cst_19 {dimension_numbers = #tpu.dot_dimension_numbers<[1], [0], [0], [1], [0, 0, 1, 1], [], []>} : vector<8x128xbf16>, vector<128x128xbf16>, vector<8x128xf32> -> vector<8x128xf32>
      %55 = arith.addf %52, %54 : vector<8x128xf32>
      %c0_20 = arith.constant 0 : index
      %c0_21 = arith.constant 0 : index
      %56 = vector.load %arg12[%c0_20, %c0_21] : memref<8x128xf32, #tpu.memory_space<vmem>>, vector<8x128xf32>
      tpu.vector_store %arg12[%c0_20, %c0_21], %55 {strides = array<i32>} : memref<8x128xf32, #tpu.memory_space<vmem>>, vector<8x128xf32>,
      %c0_22 = arith.constant 0 : index
      %c0_23 = arith.constant 0 : index
      %57 = vector.load %arg12[%c0_22, %c0_23] : memref<8x128xf32, #tpu.memory_space<vmem>>, vector<8x128xf32>
      %c0_24 = arith.constant 0 : index
      %c0_25 = arith.constant 0 : index
      %58 = vector.load %arg6[%c0_24, %c0_25] : memref<8x128xbf16, #tpu.memory_space<vmem>>, vector<8x128xbf16>
      %cst_26 = arith.constant dense<0.000000e+00> : vector<8x128xf32>
      %59 = tpu.matmul %51, %58, %cst_26 {dimension_numbers = #tpu.dot_dimension_numbers<[1], [0], [0], [1], [0, 0, 1, 1], [], []>} : vector<8x8xbf16>, vector<8x128xbf16>, vector<8x128xf32> -> vector<8x128xf32>
      %60 = arith.addf %57, %59 : vector<8x128xf32>
      %c0_27 = arith.constant 0 : index
      %c0_28 = arith.constant 0 : index
      %61 = vector.load %arg12[%c0_27, %c0_28] : memref<8x128xf32, #tpu.memory_space<vmem>>, vector<8x128xf32>
      tpu.vector_store %arg12[%c0_27, %c0_28], %60 {strides = array<i32>} : memref<8x128xf32, #tpu.memory_space<vmem>>, vector<8x128xf32>,
    } else {
    }
    %c0_i32_3 = arith.constant 0 : i32
    %10 = arith.cmpi eq, %arg1, %c0_i32_3 : i32
    %11 = arith.extui %10 : i1 to i32
    %c0_i32_4 = arith.constant 0 : i32
    %12 = arith.cmpi ne, %11, %c0_i32_4 : i32
    scf.if %12 {
      %c8_i32 = arith.constant 8 : i32
      %13 = arith.muli %arg0, %c8_i32 : i32
      %14 = tpu.iota {dimensions = array<i32: 0>} : vector<8x1xi32>
      %15 = vector.broadcast %13 : i32 to vector<8x1xi32>
      %16 = arith.addi %15, %14 : vector<8x1xi32>
      %c0_i32_5 = arith.constant 0 : i32
      %17 = vector.broadcast %c0_i32_5 : i32 to vector<8x1xi32>
      %18 = arith.cmpi eq, %16, %17 : vector<8x1xi32>
      %c0_i32_6 = arith.constant 0 : i32
      %19 = vector.broadcast %0 : i32 to vector<8x1xi32>
      %20 = vector.broadcast %c0_i32_6 : i32 to vector<8x1xi32>
      %21 = arith.select %18, %19, %20 : vector<8x1xi1>, vector<8x1xi32>
      %22 = arith.sitofp %21 : vector<8x1xi32> to vector<8x1xf32>
      %cst = arith.constant 1.000000e+00 : f32
      %23 = vector.broadcast %cst : f32 to vector<8x1xf32>
      %24 = arith.maximumf %22, %23 : vector<8x1xf32>
      %c0_7 = arith.constant 0 : index
      %c0_8 = arith.constant 0 : index
      %25 = vector.load %arg12[%c0_7, %c0_8] : memref<8x128xf32, #tpu.memory_space<vmem>>, vector<8x128xf32>
      %26 = tpu.reciprocal %24 {approx = true} : vector<8x1xf32> -> vector<8x1xf32>
      %27 = vector.broadcast %26 : vector<8x1xf32> to vector<8x128xf32>
      %28 = arith.mulf %25, %27 : vector<8x128xf32>
      %29 = arith.truncf %28 : vector<8x128xf32> to vector<8x128xbf16>
      %c0_9 = arith.constant 0 : index
      %c0_10 = arith.constant 0 : index
      %30 = vector.load %arg7[%c0_9, %c0_10] : memref<128x128xbf16, #tpu.memory_space<vmem>>, vector<128x128xbf16>
      %cst_11 = arith.constant dense<0.000000e+00> : vector<8x128xf32>
      %31 = tpu.matmul %29, %30, %cst_11 {dimension_numbers = #tpu.dot_dimension_numbers<[1], [0], [0], [1], [0, 0, 1, 1], [], []>} : vector<8x128xbf16>, vector<128x128xbf16>, vector<8x128xf32> -> vector<8x128xf32>
      %c0_12 = arith.constant 0 : index
      %c0_13 = arith.constant 0 : index
      %32 = vector.load %arg8[%c0_12, %c0_13] : memref<1x128xf32, #tpu.memory_space<vmem>>, vector<1x128xf32>
      %33 = vector.broadcast %32 : vector<1x128xf32> to vector<8x128xf32>
      %34 = arith.addf %31, %33 : vector<8x128xf32>
      %35 = math.tanh %34 : vector<8x128xf32>
      %36 = arith.truncf %35 : vector<8x128xf32> to vector<8x128xbf16>
      %c0_14 = arith.constant 0 : index
      %c0_15 = arith.constant 0 : index
      %37 = vector.load %arg9[%c0_14, %c0_15] : memref<128x128xbf16, #tpu.memory_space<vmem>>, vector<128x128xbf16>
      %cst_16 = arith.constant dense<0.000000e+00> : vector<8x128xf32>
      %38 = tpu.matmul %36, %37, %cst_16 {dimension_numbers = #tpu.dot_dimension_numbers<[1], [0], [0], [1], [0, 0, 1, 1], [], []>} : vector<8x128xbf16>, vector<128x128xbf16>, vector<8x128xf32> -> vector<8x128xf32>
      %c0_17 = arith.constant 0 : index
      %c0_18 = arith.constant 0 : index
      %39 = vector.load %arg10[%c0_17, %c0_18] : memref<1x128xf32, #tpu.memory_space<vmem>>, vector<1x128xf32>
      %40 = vector.broadcast %39 : vector<1x128xf32> to vector<8x128xf32>
      %41 = arith.addf %38, %40 : vector<8x128xf32>
      %c0_19 = arith.constant 0 : index
      %c0_20 = arith.constant 0 : index
      %42 = vector.load %arg11[%c0_19, %c0_20] : memref<8x128xf32, #tpu.memory_space<vmem>>, vector<8x128xf32>
      tpu.vector_store %arg11[%c0_19, %c0_20], %41 {strides = array<i32>} : memref<8x128xf32, #tpu.memory_space<vmem>>, vector<8x128xf32>,
    } else {
    }
    return
  }
  func.func @transform_0(%arg0: i32, %arg1: i32, %arg2: memref<2xi32, #tpu.memory_space<smem>>) -> (i32, i32) {
    %c0_i32 = arith.constant 0 : i32
    return %arg0, %arg1 : i32, i32
  }
  func.func @transform_1(%arg0: i32, %arg1: i32, %arg2: memref<2xi32, #tpu.memory_space<smem>>) -> (i32, i32) {
    %c0_i32 = arith.constant 0 : i32
    return %arg0, %arg1 : i32, i32
  }
  func.func @transform_2(%arg0: i32, %arg1: i32, %arg2: memref<2xi32, #tpu.memory_space<smem>>) -> (i32, i32) {
    %c0_i32 = arith.constant 0 : i32
    %c0_i32_0 = arith.constant 0 : i32
    %c0_i32_1 = arith.constant 0 : i32
    return %c0_i32, %c0_i32_0 : i32, i32
  }
  func.func @transform_3(%arg0: i32, %arg1: i32, %arg2: memref<2xi32, #tpu.memory_space<smem>>) -> (i32, i32) {
    %c0_i32 = arith.constant 0 : i32
    %c0_i32_0 = arith.constant 0 : i32
    %c0_i32_1 = arith.constant 0 : i32
    return %c0_i32, %c0_i32_0 : i32, i32
  }
  func.func @transform_4(%arg0: i32, %arg1: i32, %arg2: memref<2xi32, #tpu.memory_space<smem>>) -> (i32, i32) {
    %c0_i32 = arith.constant 0 : i32
    %c0_i32_0 = arith.constant 0 : i32
    %c0_i32_1 = arith.constant 0 : i32
    return %c0_i32, %c0_i32_0 : i32, i32
  }
  func.func @transform_5(%arg0: i32, %arg1: i32, %arg2: memref<2xi32, #tpu.memory_space<smem>>) -> (i32, i32) {
    %c0_i32 = arith.constant 0 : i32
    %c0_i32_0 = arith.constant 0 : i32
    %c0_i32_1 = arith.constant 0 : i32
    return %c0_i32, %c0_i32_0 : i32, i32
  }
  func.func @transform_6(%arg0: i32, %arg1: i32, %arg2: memref<2xi32, #tpu.memory_space<smem>>) -> (i32, i32) {
    %c0_i32 = arith.constant 0 : i32
    %c0_i32_0 = arith.constant 0 : i32
    %c0_i32_1 = arith.constant 0 : i32
    return %c0_i32, %c0_i32_0 : i32, i32
  }
  func.func @transform_7(%arg0: i32, %arg1: i32, %arg2: memref<2xi32, #tpu.memory_space<smem>>) -> (i32, i32) {
    %c0_i32 = arith.constant 0 : i32
    %c0_i32_0 = arith.constant 0 : i32
    %c0_i32_1 = arith.constant 0 : i32
    return %c0_i32, %c0_i32_0 : i32, i32
  }
  func.func @transform_8(%arg0: i32, %arg1: i32, %arg2: memref<2xi32, #tpu.memory_space<smem>>) -> (i32, i32) {
    %c0_i32 = arith.constant 0 : i32
    %c0_i32_0 = arith.constant 0 : i32
    return %arg0, %c0_i32 : i32, i32
  }
}

</mosaic_0001>

<bundles_post_ra>
// kernel: tpu_custom_call.1
= control target key start
LH: loop header
LB: loop body
LE: loop exit
PB: predicated region body
PF: predicated region fallthrough
CT: control target
= control target key end

     0   :  { %s2665_s30 = smov [#allocation4]   ;;  %s3886_s0 = inlined_call_operand.hbm [shape: s32[2], index: 0, kind: input, shape index: {}]   ;;  %s3887_s1 = inlined_call_operand.hbm [shape: s32[8,128], index: 1, kind: input, shape index: {}]   ;;  %s3888_s2 = inlined_call_operand.hbm [shape: s32[8,128], index: 2, kind: input, shape index: {}]   ;;  %s3889_s3 = inlined_call_operand.hbm [shape: bf16[128,128], index: 3, kind: input, shape index: {}]   ;;  %s3890_s4 = inlined_call_operand.vmem [shape: bf16[8,128], index: 4, kind: input, shape index: {}]   ;;  %s3891_s5 = inlined_call_operand.hbm [shape: bf16[128,128], index: 5, kind: input, shape index: {}]   ;;  %s3892_s6 = inlined_call_operand.vmem [shape: f32[1,128], index: 6, kind: input, shape index: {}]   ;;  %s3893_s7 = inlined_call_operand.hbm [shape: bf16[128,128], index: 7, kind: input, shape index: {}]   ;;  %s3894_s8 = inlined_call_operand.vmem [shape: f32[1,128], index: 8, kind: input, shape index: {}]   ;;  %s3895_s9 = inlined_call_operand.hbm [shape: f32[8,128], index: 9, kind: output, shape index: {}]  }
   0x1   :  { %15 = dma.hbm_to_smem %s3886_s0, 16, %s2665_s30, [#allocation3] }
   0x2   :  { %2655 = dma.done.wait [#allocation3], 16 }
   0x3   :  { %2656 = vsyncadd [#allocation3], 4294967280 }
   0x4   :  { %17 = sfence }
   0x5   :  { %18 = vsyncpa [#allocation6], 0 }
   0x6   :  { %19 = vsyncpa [#allocation9], 0 }
   0x7   :  { %20 = vsyncpa [#allocation12], 0 }
   0x8   :  { %21 = vsyncpa [#allocation7], 0  ;;  %s2666_s12 = smov [#allocation8]  }
   0x9   :  { %s38_s13 = sshll.u32 %s2666_s12, 4  ;;  %s39_s13 = int_to_ptr.vmem [resolvable:$true] %s38_s13 }
   0xa   :  { %s2543_s14 = scalar_lea.vmem %s39_s13, 128  ;;  %p2548_p1 = scmp.lt.s32.totalorder %s39_s13, %s39_s13 }
   0xb   :  { %p2544_p0 = scmp.ne.s32.totalorder %s39_s13, %s2543_s14  ;;  %p2549_p2 = scmp.lt.s32.totalorder %s2543_s14, %s2543_s14 }
   0xd   :  { %p2550_p3 = por %p2549_p2, %p2548_p1 }
   0xf   :  { %p2551_p4 = pnand %p2550_p3, %p2544_p0 }
  0x11   :  { %2554 = shalt.err (!%p2551_p4)
}
  0x12   :  { %41 = dma.hbm_to_vmem [thread:$0]  %s3888_s2, 128, %s39_s13, [#allocation9]  }
  0x13   :  { %s2667_s0 = smov [#allocation11]   ;;  %s2668_s18 = smov [#allocation5]  }
  0x14   :  { %s61_s17 = sshll.u32 %s2667_s0, 4  ;;  %s28_s19 = sshll.u32 %s2668_s18, 4  ;;  %s62_s17 = int_to_ptr.vmem [resolvable:$true] %s61_s17  ;;  %s29_s19 = int_to_ptr.vmem [resolvable:$true] %s28_s19 }
  0x15   :  { %s2563_s20 = scalar_lea.vmem %s62_s17, 1024  ;;  %p2568_p6 = scmp.lt.s32.totalorder %s62_s17, %s62_s17 }
  0x16   :  { %p2564_p5 = scmp.ne.s32.totalorder %s62_s17, %s2563_s20  ;;  %p2569_p7 = scmp.lt.s32.totalorder %s2563_s20, %s2563_s20 }
  0x18   :  { %p2570_p8 = por %p2569_p7, %p2568_p6 }
  0x1a   :  { %p2571_p9 = pnand %p2570_p8, %p2564_p5 }
  0x1c   :  { %2574 = shalt.err (!%p2571_p9)
}
  0x1d   :  { %s2669_s21 = smov 64   ;;  %s2670_s22 = smov 4  }
  0x1e   :  { %67 = dma.hbm_to_vmem [thread:$0]  %s3891_s5, 1024, %s62_s17, [#allocation12], %s2669_s21, %s2669_s21, %s2670_s22  }
  0x1f   :  { %s2583_s2 = scalar_lea.vmem %s29_s19, 128  ;;  %p2588_p11 = scmp.lt.s32.totalorder %s29_s19, %s29_s19 }
  0x20   :  { %p2584_p10 = scmp.ne.s32.totalorder %s29_s19, %s2583_s2  ;;  %p2589_p12 = scmp.lt.s32.totalorder %s2583_s2, %s2583_s2 }
  0x22   :  { %p2590_p13 = por %p2589_p12, %p2588_p11 }
  0x24   :  { %p2591_p0 = pnand %p2590_p13, %p2584_p10 }
  0x26   :  { %2594 = shalt.err (!%p2591_p0)
}
  0x27   :  { %31 = dma.hbm_to_vmem [thread:$0]  %s3887_s1, 128, %s29_s19, [#allocation6]  }
  0x28   :  { %s2671_s27 = smov [#allocation10]   ;;  %s2672_s29 = smov [#allocation13]  }
  0x29   :  { %s47_s28 = sshll.u32 %s2671_s27, 4  ;;  %s75_s30 = sshll.u32 %s2672_s29, 4  ;;  %s48_s28 = int_to_ptr.vmem [resolvable:$true] %s47_s28  ;;  %s76_s30 = int_to_ptr.vmem [resolvable:$true] %s75_s30 }
  0x2a   :  { %s2603_s10 = scalar_lea.vmem %s48_s28, 1024  ;;  %p2608_p2 = scmp.lt.s32.totalorder %s48_s28, %s48_s28 }
  0x2b   :  { %p2604_p1 = scmp.ne.s32.totalorder %s48_s28, %s2603_s10  ;;  %p2609_p3 = scmp.lt.s32.totalorder %s2603_s10, %s2603_s10 }
  0x2d   :  { %p2610_p4 = por %p2609_p3, %p2608_p2 }
  0x2f   :  { %p2611_p5 = pnand %p2610_p4, %p2604_p1 }
  0x31   :  { %2614 = shalt.err (!%p2611_p5)
}
  0x32   :  { %53 = dma.hbm_to_vmem [thread:$0]  %s3889_s3, 1024, %s48_s28, [#allocation9], %s2669_s21, %s2669_s21, %s2670_s22  }
  0x33   :  { %s2623_s1 = scalar_lea.vmem %s76_s30, 1024  ;;  %p2628_p7 = scmp.lt.s32.totalorder %s76_s30, %s76_s30 }
  0x34   :  { %p2624_p6 = scmp.ne.s32.totalorder %s76_s30, %s2623_s1  ;;  %p2629_p8 = scmp.lt.s32.totalorder %s2623_s1, %s2623_s1 }
  0x36   :  { %p2630_p9 = por %p2629_p8, %p2628_p7 }
  0x38   :  { %p2631_p10 = pnand %p2630_p9, %p2624_p6 }
  0x3a   :  { %2634 = shalt.err (!%p2631_p10)
}
  0x3b   :  { %81 = dma.hbm_to_vmem [thread:$0]  %s3893_s7, 1024, %s76_s30, [#allocation12], %s2669_s21, %s2669_s21, %s2670_s22  }
  0x3c   :  { %2657 = dma.done.wait [#allocation6], 128  }
  0x3d   :  { %2658 = vsyncadd [#allocation6], 4294967168 }
  0x3e   :  { %2659 = dma.done.wait [#allocation9], 1152  }
  0x3f   :  { %2660 = vsyncadd [#allocation9], 4294966144 }
  0x40   :  { %2661 = dma.done.wait [#allocation12], 2048  }
  0x41   :  { %2662 = vsyncadd [#allocation12], 4294965248  ;;  %s2756_s3 = sld [smem:[#allocation4]]  ;;  %v2673_v0 = vmov 0.0  }
  0x42   :  { %106 = vst [vmem:[#allocation2] sm:$0xff] %v2673_v0 }
  0x47   :  { %p2356_p11 = scmp.gt.s32.totalorder %s2756_s3, 0 }
  0x48   :  { %v115_v1 = vlaneseq (%p2356_p11)  ;;  %v125_v2 = vstv (%p2356_p11), %s2756_s3  ;;  %v2674_v3 = vmov (%p2356_p11), 1966171168   ;;  %v2675_v5 = vmov (%p2356_p11), 0.0   ;;  %v2767_v9 = vld [vmem:[#allocation5] sm:$0xff] (%p2356_p11) }
  0x49   :  { %112 = sbr.rel (!%p2356_p11) target bundleno = 702 (0x2be), region = 61  ;;  %v146_v4 = vunpack.c.l.s4 (%p2356_p11), %v2674_v3  ;;  %2417 = vmatprep.subr.bf16.mxu0 (%p2356_p11), %v2675_v5  ;;  %2437 = vmatprep.subr.bf16.mxu1 (%p2356_p11), %v2675_v5  ;;  %v144_v45 = vcombine.high (%p2356_p11), %v2767_v9, %v2767_v9 }
  0x4a   :  { %v2763_v6 = vand.u32 (%p2356_p11), 127, %v115_v1  ;;  %v2765_v7 = vshrl.u32 (%p2356_p11), %v115_v1, 7 }
  0x4b   :  { %v147_v8 = vunpack.c.0.s8 (%p2356_p11), %v146_v4 }
  0x4c   :  { %vm124_vm0 = vcmp.eq.s32.totalorder (%p2356_p11), %v2765_v7, 0  ;;  %vm126_vm1 = vcmp.lt.s32.totalorder (%p2356_p11), %v2763_v6, %v125_v2  ;;  %v2778_v12 = vsub.s32 (%p2356_p11), 0, %v2765_v7  ;;  %v2785_v15 = vadd.s32 (%p2356_p11), 24, %v2765_v7 }
  0x4d   :  { %vm127_vm2 = vmand (%p2356_p11), %vm124_vm0, %vm126_vm1  ;;  %v2772_v10 = vsub.s32 (%p2356_p11), %v147_v8, %v2765_v7  ;;  %v2788_v16 = vadd.s32 (%p2356_p11), 8, %v2765_v7  ;;  %v2801_v25 = vadd.s32 (%p2356_p11), 16, %v2765_v7  ;;  %v2864_v49 = vadd.s32 (%p2356_p11), 40, %v2765_v7 }
  0x4e   :  { %v2775_v11 = vsel %vm127_vm2, 1.0, %v2675_v5  ;;  %v2867_v50 = vadd.s32 32, %v2765_v7 }
  0x4f   :  { %v151_v13 = vrot.slane %v2767_v9, %v2772_v10  ;;  %v361_v14 = vrot.slane %v2775_v11, %v2772_v10  ;;  %v354_v51 = vcombine.high %v2775_v11, %v2775_v11  ;;  %v158_v54 = vrot.slane %v144_v45, %v2772_v10 }
  0x51   :  { %v167_v17 = vrot.slane %v151_v13, %v2772_v10  ;;  %v377_v18 = vrot.slane %v361_v14, %v2772_v10  ;;  %v159_v19 = vcombine.high %v151_v13, %v151_v13  ;;  %v369_v20 = vcombine.high %v361_v14, %v361_v14 }
  0x52   :  { %v368_v57 = vrot.slane %v354_v51, %v2772_v10  ;;  %v2886_v58 = vrot.slane %v158_v54, %v2772_v10  ;;  %v160_v3 = vcombine.high %v158_v54, %v158_v54 }
  0x53   :  { %v2793_v21 = vrot.slane %v167_v17, %v2778_v12  ;;  %v2796_v22 = vrot.slane %v377_v18, %v2778_v12  ;;  %v181_v23 = vrot.slane %v159_v19, %v2772_v10  ;;  %v391_v24 = vrot.slane %v369_v20, %v2772_v10 }
  0x54   :  { %v189_v32 = vcombine.high %v167_v17, %v167_v17  ;;  %v399_v35 = vcombine.high %v377_v18, %v377_v18  ;;  %v2891_v61 = vrot.slane %v368_v57, %v2772_v10  ;;  %v2899_v62 = vrot.slane %v2886_v58, %v2778_v12 }
  0x55   :  { %vm228_vm3 = vcmp.eq.s32.totalorder %v2793_v21, %v2785_v15  ;;  %vm225_vm4 = vcmp.eq.s32.totalorder %v2793_v21, %v2765_v7  ;;  %vm226_vm5 = vcmp.eq.s32.totalorder %v2793_v21, %v2788_v16  ;;  %v2810_v26 = vrot.slane %v181_v23, %v2778_v12 }
  0x56   :  { %v446_v27 = vsel %vm228_vm3, %v2796_v22, 0.0  ;;  %v443_v28 = vsel %vm225_vm4, %v2796_v22, 0.0  ;;  %v2815_v29 = vrot.slane %v391_v24, %v2778_v12  ;;  %v444_v30 = vsel %vm226_vm5, %v2796_v22, 0.0 }
  0x57   :  { %577 = vadd.xlane.f32.xlu1 %v446_v27  ;;  %571 = vadd.xlane.f32.xlu0 %v443_v28  ;;  %vm241_vm6 = vcmp.eq.s32.totalorder %v2810_v26, %v2765_v7  ;;  %vm227_vm7 = vcmp.eq.s32.totalorder %v2793_v21, %v2801_v25  ;;  %vm242_vm8 = vcmp.eq.s32.totalorder %v2810_v26, %v2788_v16  ;;  %v2947_v27 = vadd.s32 48, %v2765_v7 }
  0x58   :  { %v459_v31 = vsel %vm241_vm6, %v2815_v29, 0.0  ;;  %v445_v33 = vsel %vm227_vm7, %v2796_v22, 0.0  ;;  %v460_v34 = vsel %vm242_vm8, %v2815_v29, 0.0  ;;  %vm243_vm9 = vcmp.eq.s32.totalorder %v2810_v26, %v2801_v25 }
  0x59   :  { %vm244_vm10 = vcmp.eq.s32.totalorder %v2810_v26, %v2785_v15  ;;  %v2832_v36 = vrot.slane %v189_v32, %v2778_v12  ;;  %v461_v37 = vsel %vm243_vm9, %v2815_v29, 0.0  ;;  %v2837_v39 = vrot.slane %v399_v35, %v2778_v12 }
  0x5a   :  { %v462_v38 = vsel %vm244_vm10, %v2815_v29, 0.0  ;;  %v191_v40 = vcombine.high %v181_v23, %v181_v23  ;;  %v401_v43 = vcombine.high %v391_v24, %v391_v24  ;;  %vm230_vm1 = vcmp.eq.s32.totalorder %v2793_v21, %v2864_v49 }
  0x5b   :  { %573 = vadd.xlane.f32.xlu0 %v444_v30  ;;  %603 = vadd.xlane.f32.xlu1 %v459_v31  ;;  %vm257_vm11 = vcmp.eq.s32.totalorder %v2832_v36, %v2765_v7  ;;  %vm258_vm12 = vcmp.eq.s32.totalorder %v2832_v36, %v2788_v16  ;;  %vm259_vm13 = vcmp.eq.s32.totalorder %v2832_v36, %v2801_v25  ;;  %v448_v55 = vsel %vm230_vm1, %v2796_v22, 0.0 }
  0x5c   :  { %v475_v41 = vsel %vm257_vm11, %v2837_v39, 0.0  ;;  %v476_v42 = vsel %vm258_vm12, %v2837_v39, 0.0  ;;  %vm260_vm14 = vcmp.eq.s32.totalorder %v2832_v36, %v2785_v15  ;;  %v2850_v44 = vrot.slane %v191_v40, %v2778_v12 }
  0x5d   :  { %v477_v46 = vsel %vm259_vm13, %v2837_v39, 0.0  ;;  %v478_v47 = vsel %vm260_vm14, %v2837_v39, 0.0  ;;  %v2857_v48 = vrot.slane %v401_v43, %v2778_v12  ;;  %vm229_vm2 = vcmp.eq.s32.totalorder %v2793_v21, %v2867_v50 }
  0x5e   :  { %vm274_vm15 = vcmp.eq.s32.totalorder %v2850_v44, %v2788_v16  ;;  %vm273_vm0 = vcmp.eq.s32.totalorder %v2850_v44, %v2765_v7  ;;  %v447_v56 = vsel %vm229_vm2, %v2796_v22, 0.0  ;;  %vm246_vm3 = vcmp.eq.s32.totalorder %v2810_v26, %v2864_v49 }
  0x5f   :  { %575 = vadd.xlane.f32.xlu0 %v445_v33  ;;  %605 = vadd.xlane.f32.xlu1 %v460_v34  ;;  %v492_v52 = vsel %vm274_vm15, %v2857_v48, 0.0  ;;  %v491_v53 = vsel %vm273_vm0, %v2857_v48, 0.0  ;;  %vm245_vm4 = vcmp.eq.s32.totalorder %v2810_v26, %v2867_v50  ;;  %v464_v59 = vsel %vm246_vm3, %v2815_v29, 0.0 }
  0x60   :  { %v463_v60 = vsel %vm245_vm4, %v2815_v29, 0.0  ;;  %vm276_vm5 = vcmp.eq.s32.totalorder %v2850_v44, %v2785_v15  ;;  %vm275_vm6 = vcmp.eq.s32.totalorder %v2850_v44, %v2801_v25  ;;  %v2905_v2 = vrot.slane %v2891_v61, %v2778_v12 }
  0x61   :  { %v494_v63 = vsel %vm276_vm5, %v2857_v48, 0.0  ;;  %v493_v1 = vsel %vm275_vm6, %v2857_v48, 0.0  ;;  %vm290_vm7 = vcmp.eq.s32.totalorder %v2899_v62, %v2788_v16  ;;  %vm289_vm8 = vcmp.eq.s32.totalorder %v2899_v62, %v2765_v7 }
  0x62   :  { %v508_v4 = vsel %vm290_vm7, %v2905_v2, 0.0  ;;  %v507_v8 = vsel %vm289_vm8, %v2905_v2, 0.0  ;;  %v370_v9 = vcombine.high %v368_v57, %v368_v57  ;;  %vm262_vm9 = vcmp.eq.s32.totalorder %v2832_v36, %v2864_v49 }
  0x63   :  { %607 = vadd.xlane.f32.xlu0 %v461_v37  ;;  %609 = vadd.xlane.f32.xlu1 %v462_v38  ;;  %vm261_vm10 = vcmp.eq.s32.totalorder %v2832_v36, %v2867_v50  ;;  %v2918_v11 = vrot.slane %v160_v3, %v2772_v10  ;;  %v480_v13 = vsel %vm262_vm9, %v2837_v39, 0.0  ;;  %vm292_vm11 = vcmp.eq.s32.totalorder %v2899_v62, %v2785_v15 }
  0x64   :  { %v479_v14 = vsel %vm261_vm10, %v2837_v39, 0.0  ;;  %v2923_v17 = vrot.slane %v370_v9, %v2772_v10  ;;  %vm291_vm12 = vcmp.eq.s32.totalorder %v2899_v62, %v2801_v25  ;;  %v510_v19 = vsel %vm292_vm11, %v2905_v2, 0.0 }
  0x65   :  { %v2931_v18 = vrot.slane %v2918_v11, %v2778_v12  ;;  %v509_v20 = vsel %vm291_vm12, %v2905_v2, 0.0  ;;  %v2944_v24 = vadd.s32 56, %v2765_v7  ;;  %vm231_vm0 = vcmp.eq.s32.totalorder %v2793_v21, %v2947_v27 }
  0x66   :  { %v2937_v23 = vrot.slane %v2923_v17, %v2778_v12  ;;  %v449_v32 = vsel %vm231_vm0, %v2796_v22, 0.0  ;;  %vm247_vm2 = vcmp.eq.s32.totalorder %v2810_v26, %v2947_v27  ;;  %vm278_vm3 = vcmp.eq.s32.totalorder %v2850_v44, %v2864_v49 }
  0x67   :  { %635 = vadd.xlane.f32.xlu0 %v475_v41  ;;  %637 = vadd.xlane.f32.xlu1 %v476_v42  ;;  %vm306_vm13 = vcmp.eq.s32.totalorder %v2931_v18, %v2788_v16  ;;  %vm305_vm14 = vcmp.eq.s32.totalorder %v2931_v18, %v2765_v7  ;;  %vm232_vm15 = vcmp.eq.s32.totalorder %v2793_v21, %v2944_v24  ;;  %v465_v34 = vsel %vm247_vm2, %v2815_v29, 0.0 }
  0x68   :  { %v524_v28 = vsel %vm306_vm13, %v2937_v23, 0.0  ;;  %v523_v30 = vsel %vm305_vm14, %v2937_v23, 0.0  ;;  %v450_v31 = vsel %vm232_vm15, %v2796_v22, 0.0  ;;  %vm248_vm1 = vcmp.eq.s32.totalorder %v2810_v26, %v2944_v24 }
  0x69   :  { %v466_v33 = vsel %vm248_vm1, %v2815_v29, 0.0  ;;  %vm277_vm4 = vcmp.eq.s32.totalorder %v2850_v44, %v2867_v50  ;;  %v190_v35 = vcombine.high %v2886_v58, %v2886_v58  ;;  %v496_v37 = vsel %vm278_vm3, %v2857_v48, 0.0 }
  0x6a   :  { %v495_v38 = vsel %vm277_vm4, %v2857_v48, 0.0  ;;  %v400_v40 = vcombine.high %v2891_v61, %v2891_v61  ;;  %vm308_vm5 = vcmp.eq.s32.totalorder %v2931_v18, %v2785_v15  ;;  %vm307_vm6 = vcmp.eq.s32.totalorder %v2931_v18, %v2801_v25 }
  0x6b   :  { %639 = vadd.xlane.f32.xlu0 %v477_v46  ;;  %641 = vadd.xlane.f32.xlu1 %v478_v47  ;;  %v2978_v41 = vrot.slane %v190_v35, %v2778_v12  ;;  %v526_v42 = vsel %vm308_vm5, %v2937_v23, 0.0  ;;  %v525_v43 = vsel %vm307_vm6, %v2937_v23, 0.0  ;;  %vm264_vm9 = vcmp.eq.s32.totalorder %v2832_v36, %v2944_v24 }
  0x6c   :  { %v2983_v45 = vrot.slane %v400_v40, %v2778_v12  ;;  %vm263_vm10 = vcmp.eq.s32.totalorder %v2832_v36, %v2947_v27  ;;  %v482_v51 = vsel %vm264_vm9, %v2837_v39, 0.0  ;;  %vm294_vm11 = vcmp.eq.s32.totalorder %v2899_v62, %v2864_v49 }
  0x6d   :  { %vm322_vm7 = vcmp.eq.s32.totalorder %v2978_v41, %v2788_v16  ;;  %vm321_vm8 = vcmp.eq.s32.totalorder %v2978_v41, %v2765_v7  ;;  %vm293_vm12 = vcmp.eq.s32.totalorder %v2899_v62, %v2867_v50  ;;  %v512_v54 = vsel %vm294_vm11, %v2905_v2, 0.0 }
  0x6e   :  { %v540_v46 = vsel %vm322_vm7, %v2983_v45, 0.0  ;;  %v539_v47 = vsel %vm321_vm8, %v2983_v45, 0.0  ;;  %vm324_vm13 = vcmp.eq.s32.totalorder %v2978_v41, %v2785_v15  ;;  %vm323_vm14 = vcmp.eq.s32.totalorder %v2978_v41, %v2801_v25 }
  0x6f   :  { %669 = vadd.xlane.f32.xlu1 %v492_v52  ;;  %667 = vadd.xlane.f32.xlu0 %v491_v53  ;;  %v481_v52 = vsel %vm263_vm10, %v2837_v39, 0.0  ;;  %v192_v53 = vcombine.high %v2918_v11, %v2918_v11  ;;  %v542_v58 = vsel %vm324_vm13, %v2983_v45, 0.0  ;;  %v3024_v61 = vadd.s32 72, %v2765_v7 }
  0x70   :  { %vm280_vm5 = vcmp.eq.s32.totalorder %v2850_v44, %v2944_v24  ;;  %vm279_vm6 = vcmp.eq.s32.totalorder %v2850_v44, %v2947_v27  ;;  %vm310_vm7 = vcmp.eq.s32.totalorder %v2931_v18, %v2864_v49  ;;  %vm309_vm8 = vcmp.eq.s32.totalorder %v2931_v18, %v2867_v50 }
  0x71   :  { %v3012_v57 = vrot.slane %v192_v53, %v2778_v12  ;;  %vm234_vm1 = vcmp.eq.s32.totalorder %v2793_v21, %v3024_v61  ;;  %vm250_vm3 = vcmp.eq.s32.totalorder %v2810_v26, %v3024_v61  ;;  %v498_v11 = vsel %vm280_vm5, %v2857_v48, 0.0 }
  0x72   :  { %vm266_vm11 = vcmp.eq.s32.totalorder %v2832_v36, %v3024_v61  ;;  %vm296_vm13 = vcmp.eq.s32.totalorder %v2899_v62, %v2944_v24  ;;  %vm282_vm5 = vcmp.eq.s32.totalorder %v2850_v44, %v3024_v61 }
  0x73   :  { %581 = vadd.xlane.f32.xlu1 %v448_v55  ;;  %579 = vadd.xlane.f32.xlu0 %v447_v56  ;;  %v511_v55 = vsel %vm293_vm12, %v2905_v2, 0.0  ;;  %v402_v56 = vcombine.high %v2923_v17, %v2923_v17  ;;  %vm338_vm15 = vcmp.eq.s32.totalorder %v3012_v57, %v2788_v16  ;;  %vm337_vm0 = vcmp.eq.s32.totalorder %v3012_v57, %v2765_v7 }
  0x74   :  { %v452_v16 = vsel %vm234_vm1, %v2796_v22, 0.0  ;;  %v527_v17 = vsel %vm309_vm8, %v2937_v23, 0.0  ;;  %vm340_vm9 = vcmp.eq.s32.totalorder %v3012_v57, %v2785_v15  ;;  %vm339_vm10 = vcmp.eq.s32.totalorder %v3012_v57, %v2801_v25 }
  0x75   :  { %v514_v25 = vsel %vm296_vm13, %v2905_v2, 0.0  ;;  %vm311_vm8 = vcmp.eq.s32.totalorder %v2931_v18, %v2947_v27  ;;  %vm298_vm13 = vcmp.eq.s32.totalorder %v2899_v62, %v3024_v61 }
  0x77   :  { %613 = vadd.xlane.f32.xlu1 %v464_v59  ;;  %611 = vadd.xlane.f32.xlu0 %v463_v60  ;;  %v541_v59 = vsel %vm323_vm14, %v2983_v45, 0.0  ;;  %v3017_v60 = vrot.slane %v402_v56, %v2778_v12  ;;  %vm295_vm14 = vcmp.eq.s32.totalorder %v2899_v62, %v2947_v27 }
  0x79   :  { %v555_v3 = vsel %vm337_vm0, %v3017_v60, 0.0  ;;  %vm325_vm0 = vcmp.eq.s32.totalorder %v2978_v41, %v2867_v50 }
  0x7b   :  { %673 = vadd.xlane.f32.xlu1 %v494_v63  ;;  %671 = vadd.xlane.f32.xlu0 %v493_v1  ;;  %v3027_v63 = vadd.s32 64, %v2765_v7  ;;  %v556_v1 = vsel %vm338_vm15, %v3017_v60, 0.0  ;;  %vm326_vm15 = vcmp.eq.s32.totalorder %v2978_v41, %v2864_v49 }
  0x7d   :  { %vm233_vm2 = vcmp.eq.s32.totalorder %v2793_v21, %v3027_v63  ;;  %vm249_vm4 = vcmp.eq.s32.totalorder %v2810_v26, %v3027_v63  ;;  %vm265_vm12 = vcmp.eq.s32.totalorder %v2832_v36, %v3027_v63 }
  0x7e   :  { %v467_v9 = vsel %vm249_vm4, %v2815_v29, 0.0  ;;  %v483_v15 = vsel %vm265_vm12, %v2837_v39, 0.0 }
  0x7f   :  { %701 = vadd.xlane.f32.xlu1 %v508_v4  ;;  %699 = vadd.xlane.f32.xlu0 %v507_v8  ;;  %v451_v4 = vsel %vm233_vm2, %v2796_v22, 0.0  ;;  %v468_v8 = vsel %vm250_vm3, %v2815_v29, 0.0 }
  0x83   :  { %645 = vadd.xlane.f32.xlu1 %v480_v13  ;;  %643 = vadd.xlane.f32.xlu0 %v479_v14  ;;  %v497_v13 = vsel %vm279_vm6, %v2857_v48, 0.0  ;;  %v528_v14 = vsel %vm310_vm7, %v2937_v23, 0.0  ;;  %vm281_vm6 = vcmp.eq.s32.totalorder %v2850_v44, %v3027_v63  ;;  %vm312_vm7 = vcmp.eq.s32.totalorder %v2931_v18, %v2944_v24 }
  0x87   :  { %705 = vadd.xlane.f32.xlu1 %v510_v19  ;;  %703 = vadd.xlane.f32.xlu0 %v509_v20  ;;  %v558_v19 = vsel %vm340_vm9, %v3017_v60, 0.0  ;;  %v557_v20 = vsel %vm339_vm10, %v3017_v60, 0.0  ;;  %vm342_vm9 = vcmp.eq.s32.totalorder %v3012_v57, %v2864_v49  ;;  %vm341_vm10 = vcmp.eq.s32.totalorder %v3012_v57, %v2867_v50 }
  0x88   :  { %v560_v53 = vsel %vm342_vm9, %v3017_v60, 0.0  ;;  %v1232_v49 = vadd.s32 4294967280, %v2763_v6 }
  0x8b   :  { %733 = vadd.xlane.f32.xlu1 %v524_v28  ;;  %731 = vadd.xlane.f32.xlu0 %v523_v30  ;;  %v484_v28 = vsel %vm266_vm11, %v2837_v39, 0.0  ;;  %v513_v30 = vsel %vm295_vm14, %v2905_v2, 0.0  ;;  %vm297_vm14 = vcmp.eq.s32.totalorder %v2899_v62, %v3027_v63 }
  0x8f   :  { %585 = vadd.xlane.f32.xlu1 %v450_v31  ;;  %583 = vadd.xlane.f32.xlu0 %v449_v32  ;;  %v3078_v31 = vadd.s32 88, %v2765_v7  ;;  %v3081_v32 = vadd.s32 80, %v2765_v7 }
  0x91   :  { %vm236_vm1 = vcmp.eq.s32.totalorder %v2793_v21, %v3078_v31  ;;  %vm235_vm2 = vcmp.eq.s32.totalorder %v2793_v21, %v3081_v32  ;;  %vm252_vm3 = vcmp.eq.s32.totalorder %v2810_v26, %v3078_v31  ;;  %vm251_vm4 = vcmp.eq.s32.totalorder %v2810_v26, %v3081_v32 }
  0x92   :  { %v454_v35 = vsel %vm236_vm1, %v2796_v22, 0.0  ;;  %v469_v40 = vsel %vm251_vm4, %v2815_v29, 0.0  ;;  %vm268_vm11 = vcmp.eq.s32.totalorder %v2832_v36, %v3078_v31  ;;  %vm267_vm12 = vcmp.eq.s32.totalorder %v2832_v36, %v3081_v32 }
  0x93   :  { %617 = vadd.xlane.f32.xlu1 %v466_v33  ;;  %615 = vadd.xlane.f32.xlu0 %v465_v34  ;;  %v544_v33 = vsel %vm326_vm15, %v2983_v45, 0.0  ;;  %v543_v34 = vsel %vm325_vm0, %v2983_v45, 0.0  ;;  %vm328_vm15 = vcmp.eq.s32.totalorder %v2978_v41, %v2944_v24  ;;  %vm327_vm0 = vcmp.eq.s32.totalorder %v2978_v41, %v2947_v27 }
  0x94   :  { %vm1230_vm1 = vcmask 130112   ;;  %vm283_vm9 = vcmp.eq.s32.totalorder %v2850_v44, %v3081_v32 }
  0x97   :  { %677 = vadd.xlane.f32.xlu1 %v496_v37  ;;  %675 = vadd.xlane.f32.xlu0 %v495_v38  ;;  %v453_v37 = vsel %vm235_vm2, %v2796_v22, 0.0  ;;  %v470_v38 = vsel %vm252_vm3, %v2815_v29, 0.0  ;;  %vm1237_vm2 = vcmask 195712   ;;  %vm1244_vm3 = vcmask 261312  }
  0x9b   :  { %737 = vadd.xlane.f32.xlu1 %v526_v42  ;;  %735 = vadd.xlane.f32.xlu0 %v525_v43  ;;  %v500_v42 = vsel %vm282_vm5, %v2857_v48, 0.0  ;;  %v499_v43 = vsel %vm281_vm6, %v2857_v48, 0.0 }
  0x9f   :  { %765 = vadd.xlane.f32.xlu1 %v540_v46  ;;  %763 = vadd.xlane.f32.xlu0 %v539_v47  ;;  %v530_v46 = vsel %vm312_vm7, %v2937_v23, 0.0  ;;  %v529_v47 = vsel %vm311_vm8, %v2937_v23, 0.0  ;;  %vm284_vm8 = vcmp.eq.s32.totalorder %v2850_v44, %v3078_v31 }
  0xa3   :  { %649 = vadd.xlane.f32.xlu1 %v482_v51  ;;  %647 = vadd.xlane.f32.xlu0 %v481_v52 }
  0xa7   :  { %709 = vadd.xlane.f32.xlu1 %v512_v54  ;;  %707 = vadd.xlane.f32.xlu0 %v511_v55  ;;  %v559_v54 = vsel %vm341_vm10, %v3017_v60, 0.0  ;;  %v1225_v55 = vadd.s32 4294967288, %v2763_v6  ;;  %vm314_vm10 = vcmp.eq.s32.totalorder %v2931_v18, %v3024_v61 }
  0xab   :  { %769 = vadd.xlane.f32.xlu1 %v542_v58  ;;  %767 = vadd.xlane.f32.xlu0 %v541_v59  ;;  %v486_v58 = vsel %vm268_vm11, %v2837_v39, 0.0  ;;  %v485_v59 = vsel %vm267_vm12, %v2837_v39, 0.0  ;;  %vm313_vm11 = vcmp.eq.s32.totalorder %v2931_v18, %v3027_v63  ;;  %vm344_vm12 = vcmp.eq.s32.totalorder %v3012_v57, %v2944_v24 }
  0xaf   :  { %797 = vadd.xlane.f32.xlu1 %v556_v1  ;;  %795 = vadd.xlane.f32.xlu0 %v555_v3  ;;  %v1239_v1 = vadd.s32 4294967272, %v2763_v6 }
  0xb3   :  { %589 = vadd.xlane.f32.xlu1 %v452_v16  ;;  %587 = vadd.xlane.f32.xlu0 %v451_v4  ;;  %v3130_v16 = vsub.s32 %v2763_v6, %v2765_v7  ;;  %v3133_v4 = vsub.s32 %v1225_v55, %v2765_v7 }
  0xb7   :  { %621 = vadd.xlane.f32.xlu1 %v468_v8  ;;  %619 = vadd.xlane.f32.xlu0 %v467_v9 }
  0xbb   :  { %681 = vadd.xlane.f32.xlu1 %v498_v11  ;;  %679 = vadd.xlane.f32.xlu0 %v497_v13  ;;  %v3136_v11 = vsub.s32 %v1232_v49, %v2765_v7  ;;  %v516_v13 = vsel %vm298_vm13, %v2905_v2, 0.0  ;;  %vm343_vm13 = vcmp.eq.s32.totalorder %v3012_v57, %v2947_v27 }
  0xbf   :  { %741 = vadd.xlane.f32.xlu1 %v528_v14  ;;  %739 = vadd.xlane.f32.xlu0 %v527_v17  ;;  %v3140_v14 = vsub.s32 %v1239_v1, %v2765_v7 }
  0xc3   :  { %801 = vadd.xlane.f32.xlu1 %v558_v19  ;;  %799 = vadd.xlane.f32.xlu0 %v557_v20  ;;  %v515_v20 = vsel %vm297_vm14, %v2905_v2, 0.0  ;;  %vm1251_vm14 = vcmask 326912  }
  0xc7   :  { %653 = vadd.xlane.f32.xlu1 %v484_v28  ;;  %651 = vadd.xlane.f32.xlu0 %v483_v15  ;;  %v3146_v28 = vadd.s32 104, %v2765_v7 }
  0xc9   :  { %vm238_vm4 = vcmp.eq.s32.totalorder %v2793_v21, %v3146_v28  ;;  %vm254_vm6 = vcmp.eq.s32.totalorder %v2810_v26, %v3146_v28 }
  0xcb   :  { %713 = vadd.xlane.f32.xlu1 %v514_v25  ;;  %711 = vadd.xlane.f32.xlu0 %v513_v30  ;;  %v3151_v30 = vadd.s32 96, %v2765_v7 }
  0xcd   :  { %vm237_vm5 = vcmp.eq.s32.totalorder %v2793_v21, %v3151_v30  ;;  %vm253_vm7 = vcmp.eq.s32.totalorder %v2810_v26, %v3151_v30 }
  0xcf   :  { %773 = vadd.xlane.f32.xlu1 %v544_v33  ;;  %771 = vadd.xlane.f32.xlu0 %v543_v34 }
  0xd3   :  { %593 = vadd.xlane.f32.xlu1 %v454_v35  ;;  %591 = vadd.xlane.f32.xlu0 %v453_v37 }
  0xd7   :  { %625 = vadd.xlane.f32.xlu1 %v470_v38  ;;  %623 = vadd.xlane.f32.xlu0 %v469_v40 }
  0xdb   :  { %685 = vadd.xlane.f32.xlu1 %v500_v42  ;;  %683 = vadd.xlane.f32.xlu0 %v499_v43 }
  0xdf   :  { %745 = vadd.xlane.f32.xlu1 %v530_v46  ;;  %743 = vadd.xlane.f32.xlu0 %v529_v47  ;;  %v546_v46 = vsel %vm328_vm15, %v2983_v45, 0.0  ;;  %v545_v47 = vsel %vm327_vm0, %v2983_v45, 0.0  ;;  %vm1258_vm15 = vcmask 392512   ;;  %vm270_vm0 = vcmp.eq.s32.totalorder %v2832_v36, %v3146_v28 }
  0xe0   :  { %v578_v51 = vpop.xlane.xlu1 %577  ;;  %v572_v52 = vpop.xlane.xlu0 %571 }
  0xe3   :  { %805 = vadd.xlane.f32.xlu1 %v560_v53  ;;  %803 = vadd.xlane.f32.xlu0 %v559_v54 }
  0xe4   :  { %v574_v50 = vpop.xlane.xlu0 %573  ;;  %v604_v56 = vpop.xlane.xlu1 %603 }
  0xe5   :  { %v827_v3 = vpack.c.bf16 %v574_v50, %v572_v52 }
  0xe7   :  { %v1093_v8 = vunpack.c.l.b16 %v827_v3  ;;  %v1094_v9 = vunpack.c.h.b16 %v827_v3  ;;  %657 = vadd.xlane.f32.xlu1 %v486_v58  ;;  %655 = vadd.xlane.f32.xlu0 %v485_v59 }
  0xe8   :  { %v576_v17 = vpop.xlane.xlu0 %575  ;;  %v606_v19 = vpop.xlane.xlu1 %605 }
  0xe9   :  { %v828_v15 = vpack.c.bf16 %v578_v51, %v576_v17  ;;  %v835_v25 = vpack.c.bf16 %v606_v19, %v604_v56  ;;  %v1224_v33 = vrot.slane %v1093_v8, %v3130_v16  ;;  %v1229_v34 = vrot.slane %v1094_v9, %v3133_v4 }
  0xea   :  { %v456_v8 = vsel %vm238_vm4, %v2796_v22, 0.0  ;;  %v455_v9 = vsel %vm237_vm5, %v2796_v22, 0.0  ;;  %vm269_vm4 = vcmp.eq.s32.totalorder %v2832_v36, %v3151_v30  ;;  %vm300_vm5 = vcmp.eq.s32.totalorder %v2899_v62, %v3078_v31 }
  0xeb   :  { %v1095_v35 = vunpack.c.l.b16 %v828_v15  ;;  %v1096_v37 = vunpack.c.h.b16 %v828_v15  ;;  %v1109_v38 = vunpack.c.l.b16 %v835_v25  ;;  %717 = vadd.xlane.f32.xlu1 %v516_v13  ;;  %715 = vadd.xlane.f32.xlu0 %v515_v20  ;;  %v1110_v40 = vunpack.c.h.b16 %v835_v25 }
  0xec   :  { %v608_v42 = vpop.xlane.xlu0 %607  ;;  %v610_v43 = vpop.xlane.xlu1 %609  ;;  %v1231_v54 = vsel %vm1230_vm1, %v1229_v34, %v1224_v33 }
  0xed   :  { %v1236_v51 = vrot.slane %v1095_v35, %v3136_v11  ;;  %v1243_v52 = vrot.slane %v1096_v37, %v3140_v14  ;;  %v836_v53 = vpack.c.bf16 %v610_v43, %v608_v42  ;;  %v1333_v55 = vrot.slane %v1109_v38, %v3130_v16 }
  0xee   :  { %v1337_v49 = vrot.slane %v1110_v40, %v3133_v4  ;;  %v472_v38 = vsel %vm254_vm6, %v2815_v29, 0.0  ;;  %v471_v40 = vsel %vm253_vm7, %v2815_v29, 0.0  ;;  %vm299_vm6 = vcmp.eq.s32.totalorder %v2899_v62, %v3081_v32 }
  0xef   :  { %v1238_v50 = vsel %vm1237_vm2, %v1236_v51, %v1231_v54  ;;  %v1111_v56 = vunpack.c.l.b16 %v836_v53  ;;  %v1112_v58 = vunpack.c.h.b16 %v836_v53  ;;  %777 = vadd.xlane.f32.xlu1 %v546_v46  ;;  %775 = vadd.xlane.f32.xlu0 %v545_v47  ;;  %vm330_vm7 = vcmp.eq.s32.totalorder %v2978_v41, %v3024_v61 }
  0xf0   :  { %v3174_v59 = vsel %vm1244_vm3, %v1243_v52, %v1238_v50  ;;  %v636_v1 = vpop.xlane.xlu0 %635  ;;  %v638_v3 = vpop.xlane.xlu1 %637  ;;  %v1338_v20 = vsel %vm1230_vm1, %v1337_v49, %v1333_v55  ;;  %v502_v52 = vsel %vm284_vm8, %v2857_v48, 0.0  ;;  %v501_v55 = vsel %vm283_vm9, %v2857_v48, 0.0 }
  0xf1   :  { %v1342_v13 = vrot.slane %v1111_v56, %v3136_v11  ;;  %v1347_v17 = vrot.slane %v1112_v58, %v3140_v14  ;;  %v843_v19 = vpack.c.bf16 %v638_v3, %v636_v1  ;;  %v1246_v49 = vadd.s32 4294967264, %v2763_v6 }
  0xf2   :  { %v1253_v50 = vadd.s32 4294967256, %v2763_v6  ;;  %vm329_vm8 = vcmp.eq.s32.totalorder %v2978_v41, %v3027_v63 }
  0xf3   :  { %v1343_v15 = vsel %vm1237_vm2, %v1342_v13, %v1338_v20  ;;  %v1125_v25 = vunpack.c.l.b16 %v843_v19  ;;  %v1126_v33 = vunpack.c.h.b16 %v843_v19  ;;  %597 = vadd.xlane.f32.xlu1 %v456_v8  ;;  %595 = vadd.xlane.f32.xlu0 %v455_v9  ;;  %v532_v20 = vsel %vm314_vm10, %v2937_v23, 0.0 }
  0xf4   :  { %v3190_v34 = vsel %vm1244_vm3, %v1347_v17, %v1343_v15  ;;  %v640_v35 = vpop.xlane.xlu0 %639  ;;  %v642_v37 = vpop.xlane.xlu1 %641  ;;  %v3216_v17 = vsub.s32 %v1246_v49, %v2765_v7  ;;  %v531_v15 = vsel %vm313_vm11, %v2937_v23, 0.0 }
  0xf5   :  { %v844_v42 = vpack.c.bf16 %v642_v37, %v640_v35  ;;  %v1412_v43 = vrot.slane %v1125_v25, %v3130_v16  ;;  %v1416_v46 = vrot.slane %v1126_v33, %v3133_v4  ;;  %v3221_v25 = vsub.s32 %v1253_v50, %v2765_v7 }
  0xf7   :  { %v1127_v47 = vunpack.c.l.b16 %v844_v42  ;;  %v1128_v51 = vunpack.c.h.b16 %v844_v42  ;;  %629 = vadd.xlane.f32.xlu1 %v472_v38  ;;  %627 = vadd.xlane.f32.xlu0 %v471_v40  ;;  %v1417_v3 = vsel %vm1230_vm1, %v1416_v46, %v1412_v43  ;;  %v562_v42 = vsel %vm344_vm12, %v3017_v60, 0.0 }
  0xf8   :  { %v670_v53 = vpop.xlane.xlu1 %669  ;;  %v668_v54 = vpop.xlane.xlu0 %667  ;;  %v561_v43 = vsel %vm343_vm13, %v3017_v60, 0.0  ;;  %vm286_vm13 = vcmp.eq.s32.totalorder %v2850_v44, %v3146_v28 }
  0xf9   :  { %v1421_v56 = vrot.slane %v1127_v47, %v3136_v11  ;;  %v1426_v58 = vrot.slane %v1128_v51, %v3140_v14  ;;  %v851_v1 = vpack.c.bf16 %v670_v53, %v668_v54 }
  0xfb   :  { %v1422_v8 = vsel %vm1237_vm2, %v1421_v56, %v1417_v3  ;;  %689 = vadd.xlane.f32.xlu1 %v502_v52  ;;  %687 = vadd.xlane.f32.xlu0 %v501_v55  ;;  %v1141_v47 = vunpack.c.l.b16 %v851_v1  ;;  %v1142_v51 = vunpack.c.h.b16 %v851_v1  ;;  %v488_v56 = vsel %vm270_vm0, %v2837_v39, 0.0 }
  0xfc   :  { %v3213_v9 = vsel %vm1244_vm3, %v1426_v58, %v1422_v8  ;;  %v582_v13 = vpop.xlane.xlu1 %581  ;;  %v580_v19 = vpop.xlane.xlu0 %579  ;;  %v487_v58 = vsel %vm269_vm4, %v2837_v39, 0.0  ;;  %vm285_vm0 = vcmp.eq.s32.totalorder %v2850_v44, %v3151_v30  ;;  %vm316_vm4 = vcmp.eq.s32.totalorder %v2931_v18, %v3078_v31 }
  0xfd   :  { %v829_v33 = vpack.c.bf16 %v582_v13, %v580_v19  ;;  %v1491_v8 = vrot.slane %v1141_v47, %v3130_v16  ;;  %v1495_v13 = vrot.slane %v1142_v51, %v3133_v4  ;;  %v518_v19 = vsel %vm300_vm5, %v2905_v2, 0.0 }
  0xfe   :  { %vm315_vm5 = vcmp.eq.s32.totalorder %v2931_v18, %v3081_v32 }
  0xff   :  { %v1097_v35 = vunpack.c.l.b16 %v829_v33  ;;  %v1098_v37 = vunpack.c.h.b16 %v829_v33  ;;  %749 = vadd.xlane.f32.xlu1 %v532_v20  ;;  %747 = vadd.xlane.f32.xlu0 %v531_v15 }
 0x100   :  { %v614_v38 = vpop.xlane.xlu1 %613  ;;  %v612_v40 = vpop.xlane.xlu0 %611 }
 0x101   :  { %v1250_v24 = vrot.slane %v1097_v35, %v3216_v17  ;;  %v1257_v46 = vrot.slane %v1098_v37, %v3221_v25  ;;  %v837_v27 = vpack.c.bf16 %v614_v38, %v612_v40  ;;  %v517_v35 = vsel %vm299_vm6, %v2905_v2, 0.0 }
 0x102   :  { %vm1265_vm6 = vcmask 458112  }
 0x103   :  { %v1252_v52 = vsel %vm1251_vm14, %v1250_v24, %v3174_v59  ;;  %v1113_v53 = vunpack.c.l.b16 %v837_v27  ;;  %v1114_v54 = vunpack.c.h.b16 %v837_v27  ;;  %809 = vadd.xlane.f32.xlu1 %v562_v42  ;;  %807 = vadd.xlane.f32.xlu0 %v561_v43  ;;  %v3265_v42 = vadd.s32 120, %v2765_v7 }
 0x104   :  { %v3240_v55 = vsel %vm1258_vm15, %v1257_v46, %v1252_v52  ;;  %v674_v49 = vpop.xlane.xlu1 %673  ;;  %v672_v50 = vpop.xlane.xlu0 %671  ;;  %v3270_v46 = vadd.s32 112, %v2765_v7  ;;  %v1496_v27 = vsel %vm1230_vm1, %v1495_v13, %v1491_v8 }
 0x105   :  { %v1352_v59 = vrot.slane %v1113_v53, %v3216_v17  ;;  %v1357_v1 = vrot.slane %v1114_v54, %v3221_v25  ;;  %v852_v3 = vpack.c.bf16 %v674_v49, %v672_v50  ;;  %v548_v54 = vsel %vm330_vm7, %v2983_v45, 0.0 }
 0x106   :  { %v547_v49 = vsel %vm329_vm8, %v2983_v45, 0.0  ;;  %vm240_vm9 = vcmp.eq.s32.totalorder %v2793_v21, %v3265_v42  ;;  %vm239_vm10 = vcmp.eq.s32.totalorder %v2793_v21, %v3270_v46  ;;  %vm256_vm11 = vcmp.eq.s32.totalorder %v2810_v26, %v3265_v42 }
 0x107   :  { %v1353_v20 = vsel %vm1251_vm14, %v1352_v59, %v3190_v34  ;;  %v1143_v15 = vunpack.c.l.b16 %v852_v3  ;;  %v1144_v33 = vunpack.c.h.b16 %v852_v3  ;;  %661 = vadd.xlane.f32.xlu1 %v488_v56  ;;  %659 = vadd.xlane.f32.xlu0 %v487_v58  ;;  %v458_v13 = vsel %vm240_vm9, %v2796_v22, 0.0 }
 0x108   :  { %v3258_v37 = vsel %vm1258_vm15, %v1357_v1, %v1353_v20  ;;  %v702_v38 = vpop.xlane.xlu1 %701  ;;  %v700_v40 = vpop.xlane.xlu0 %699  ;;  %vm255_vm12 = vcmp.eq.s32.totalorder %v2810_v26, %v3270_v46  ;;  %vm1272_vm7 = vcmask 523712   ;;  %vm346_vm8 = vcmp.eq.s32.totalorder %v3012_v57, %v3024_v61 }
 0x109   :  { %v1500_v34 = vrot.slane %v1143_v15, %v3136_v11  ;;  %v1505_v43 = vrot.slane %v1144_v33, %v3140_v14  ;;  %v859_v24 = vpack.c.bf16 %v702_v38, %v700_v40  ;;  %v474_v38 = vsel %vm256_vm11, %v2815_v29, 0.0 }
 0x10a   :  { %v473_v26 = vsel %vm255_vm12, %v2815_v29, 0.0  ;;  %vm345_vm9 = vcmp.eq.s32.totalorder %v3012_v57, %v3027_v63  ;;  %vm271_vm11 = vcmp.eq.s32.totalorder %v2832_v36, %v3270_v46  ;;  %vm302_vm12 = vcmp.eq.s32.totalorder %v2899_v62, %v3146_v28 }
 0x10b   :  { %v1501_v47 = vsel %vm1237_vm2, %v1500_v34, %v1496_v27  ;;  %721 = vadd.xlane.f32.xlu1 %v518_v19  ;;  %719 = vadd.xlane.f32.xlu0 %v517_v35  ;;  %v1157_v56 = vunpack.c.l.b16 %v859_v24  ;;  %v1158_v58 = vunpack.c.h.b16 %v859_v24  ;;  %v457_v19 = vsel %vm239_vm10, %v2796_v22, 0.0 }
 0x10c   :  { %v3275_v51 = vsel %vm1244_vm3, %v1505_v43, %v1501_v47  ;;  %v646_v52 = vpop.xlane.xlu1 %645  ;;  %v644_v53 = vpop.xlane.xlu0 %643  ;;  %vm272_vm10 = vcmp.eq.s32.totalorder %v2832_v36, %v3265_v42  ;;  %v489_v36 = vsel %vm271_vm11, %v2837_v39, 0.0  ;;  %vm348_vm11 = vcmp.eq.s32.totalorder %v3012_v57, %v3078_v31 }
 0x10d   :  { %v845_v50 = vpack.c.bf16 %v646_v52, %v644_v53  ;;  %v1570_v33 = vrot.slane %v1157_v56, %v3130_v16  ;;  %v1574_v35 = vrot.slane %v1158_v58, %v3133_v4  ;;  %v1260_v52 = vadd.s32 4294967248, %v2763_v6 }
 0x10e   :  { %v1267_v53 = vadd.s32 4294967240, %v2763_v6 }
 0x10f   :  { %v1129_v59 = vunpack.c.l.b16 %v845_v50  ;;  %v1130_v1 = vunpack.c.h.b16 %v845_v50  ;;  %781 = vadd.xlane.f32.xlu1 %v548_v54  ;;  %779 = vadd.xlane.f32.xlu0 %v547_v49  ;;  %v1575_v50 = vsel %vm1230_vm1, %v1574_v35, %v1570_v33 }
 0x110   :  { %v706_v3 = vpop.xlane.xlu1 %705  ;;  %v704_v8 = vpop.xlane.xlu0 %703 }
 0x111   :  { %v1431_v21 = vrot.slane %v1129_v59, %v3216_v17  ;;  %v1436_v20 = vrot.slane %v1130_v1, %v3221_v25  ;;  %v860_v15 = vpack.c.bf16 %v706_v3, %v704_v8  ;;  %v3316_v1 = vsub.s32 %v1260_v52, %v2765_v7 }
 0x112   :  { %v504_v8 = vsel %vm286_vm13, %v2857_v48, 0.0  ;;  %vm301_vm13 = vcmp.eq.s32.totalorder %v2899_v62, %v3151_v30 }
 0x113   :  { %v1432_v40 = vsel %vm1251_vm14, %v1431_v21, %v3213_v9  ;;  %v1159_v34 = vunpack.c.l.b16 %v860_v15  ;;  %v1160_v43 = vunpack.c.h.b16 %v860_v15  ;;  %601 = vadd.xlane.f32.xlu1 %v458_v13  ;;  %599 = vadd.xlane.f32.xlu0 %v457_v19  ;;  %v503_v13 = vsel %vm285_vm0, %v2857_v48, 0.0 }
 0x114   :  { %v3298_v24 = vsel %vm1258_vm15, %v1436_v20, %v1432_v40  ;;  %v734_v27 = vpop.xlane.xlu1 %733  ;;  %v732_v47 = vpop.xlane.xlu0 %731  ;;  %v3321_v19 = vsub.s32 %v1267_v53, %v2765_v7  ;;  %v533_v40 = vsel %vm315_vm5, %v2937_v23, 0.0  ;;  %vm332_vm0 = vcmp.eq.s32.totalorder %v2978_v41, %v3078_v31 }
 0x115   :  { %v1579_v9 = vrot.slane %v1159_v34, %v3136_v11  ;;  %v1584_v54 = vrot.slane %v1160_v43, %v3140_v14  ;;  %v3306_v49 = vpack.c.bf16 %v734_v27, %v732_v47  ;;  %vm288_vm5 = vcmp.eq.s32.totalorder %v2850_v44, %v3265_v42 }
 0x117   :  { %v1580_v56 = vsel %vm1237_vm2, %v1579_v9, %v1575_v50  ;;  %633 = vadd.xlane.f32.xlu1 %v474_v38  ;;  %631 = vadd.xlane.f32.xlu0 %v473_v26  ;;  %v534_v38 = vsel %vm316_vm4, %v2937_v23, 0.0  ;;  %v563_v50 = vsel %vm345_vm9, %v3017_v60, 0.0  ;;  %vm331_vm4 = vcmp.eq.s32.totalorder %v2978_v41, %v3081_v32 }
 0x118   :  { %v3313_v58 = vsel %vm1244_vm3, %v1584_v54, %v1580_v56  ;;  %v586_v59 = vpop.xlane.xlu1 %585  ;;  %v584_v3 = vpop.xlane.xlu0 %583  ;;  %v564_v54 = vsel %vm346_vm8, %v3017_v60, 0.0  ;;  %vm287_vm8 = vcmp.eq.s32.totalorder %v2850_v44, %v3270_v46  ;;  %vm318_vm9 = vcmp.eq.s32.totalorder %v2931_v18, %v3146_v28 }
 0x119   :  { %v830_v21 = vpack.c.bf16 %v586_v59, %v584_v3  ;;  %v1173_v59 = vunpack.c.l.b16 %v3306_v49  ;;  %v1174_v3 = vunpack.c.h.b16 %v3306_v49 }
 0x11b   :  { %v1099_v20 = vunpack.c.l.b16 %v830_v21  ;;  %v1100_v15 = vunpack.c.h.b16 %v830_v21  ;;  %693 = vadd.xlane.f32.xlu1 %v504_v8  ;;  %691 = vadd.xlane.f32.xlu0 %v503_v13 }
 0x11c   :  { %v618_v33 = vpop.xlane.xlu1 %617  ;;  %v616_v35 = vpop.xlane.xlu0 %615 }
 0x11d   :  { %v1264_v34 = vrot.slane %v1099_v20, %v3316_v1  ;;  %v1271_v43 = vrot.slane %v1100_v15, %v3321_v19  ;;  %v838_v26 = vpack.c.bf16 %v618_v33, %v616_v35  ;;  %v490_v35 = vsel %vm272_vm10, %v2837_v39, 0.0 }
 0x11e   :  { %vm317_vm10 = vcmp.eq.s32.totalorder %v2931_v18, %v3151_v30 }
 0x11f   :  { %v1266_v27 = vsel %vm1265_vm6, %v1264_v34, %v3240_v55  ;;  %v1115_v47 = vunpack.c.l.b16 %v838_v26  ;;  %v1116_v52 = vunpack.c.h.b16 %v838_v26  ;;  %753 = vadd.xlane.f32.xlu1 %v534_v38  ;;  %751 = vadd.xlane.f32.xlu0 %v533_v40  ;;  %v1649_v40 = vrot.slane %v1173_v59, %v3130_v16 }
 0x120   :  { %v3338_v53 = vsel %vm1272_vm7, %v1271_v43, %v1266_v27  ;;  %v678_v9 = vpop.xlane.xlu1 %677  ;;  %v676_v61 = vpop.xlane.xlu0 %675  ;;  %v1653_v34 = vrot.slane %v1174_v3, %v3133_v4 }
 0x121   :  { %v1362_v63 = vrot.slane %v1115_v47, %v3316_v1  ;;  %v1367_v55 = vrot.slane %v1116_v52, %v3321_v19  ;;  %v853_v56 = vpack.c.bf16 %v678_v9, %v676_v61  ;;  %v520_v61 = vsel %vm302_vm12, %v2905_v2, 0.0 }
 0x122   :  { %vm347_vm12 = vcmp.eq.s32.totalorder %v3012_v57, %v3081_v32 }
 0x123   :  { %v1363_v8 = vsel %vm1265_vm6, %v1362_v63, %v3258_v37  ;;  %v1145_v13 = vunpack.c.l.b16 %v853_v56  ;;  %v1146_v21 = vunpack.c.h.b16 %v853_v56  ;;  %813 = vadd.xlane.f32.xlu1 %v564_v54  ;;  %811 = vadd.xlane.f32.xlu0 %v563_v50  ;;  %v519_v54 = vsel %vm301_vm13, %v2905_v2, 0.0 }
 0x124   :  { %v3353_v20 = vsel %vm1272_vm7, %v1367_v55, %v1363_v8  ;;  %v738_v15 = vpop.xlane.xlu1 %737  ;;  %v736_v33 = vpop.xlane.xlu0 %735  ;;  %v1654_v55 = vsel %vm1230_vm1, %v1653_v34, %v1649_v40  ;;  %v565_v32 = vsel %vm347_vm12, %v3017_v60, 0.0  ;;  %vm304_vm13 = vcmp.eq.s32.totalorder %v2899_v62, %v3265_v42 }
 0x125   :  { %v1510_v49 = vrot.slane %v1145_v13, %v3216_v17  ;;  %v1515_v37 = vrot.slane %v1146_v21, %v3221_v25  ;;  %v868_v38 = vpack.c.bf16 %v738_v15, %v736_v33  ;;  %v550_v13 = vsel %vm332_vm0, %v2983_v45, 0.0 }
 0x126   :  { %v549_v21 = vsel %vm331_vm4, %v2983_v45, 0.0  ;;  %vm303_vm0 = vcmp.eq.s32.totalorder %v2899_v62, %v3270_v46  ;;  %vm334_vm4 = vcmp.eq.s32.totalorder %v2978_v41, %v3146_v28  ;;  %vm350_vm12 = vcmp.eq.s32.totalorder %v3012_v57, %v3146_v28 }
 0x127   :  { %v1511_v43 = vsel %vm1251_vm14, %v1510_v49, %v3275_v51  ;;  %v1175_v26 = vunpack.c.l.b16 %v868_v38  ;;  %v1176_v27 = vunpack.c.h.b16 %v868_v38  ;;  %665 = vadd.xlane.f32.xlu1 %v490_v35  ;;  %663 = vadd.xlane.f32.xlu0 %v489_v36  ;;  %v505_v38 = vsel %vm287_vm8, %v2857_v48, 0.0 }
 0x128   :  { %v3368_v47 = vsel %vm1258_vm15, %v1515_v37, %v1511_v43  ;;  %v766_v52 = vpop.xlane.xlu1 %765  ;;  %v764_v9 = vpop.xlane.xlu0 %763  ;;  %v506_v37 = vsel %vm288_vm5, %v2857_v48, 0.0  ;;  %vm333_vm5 = vcmp.eq.s32.totalorder %v2978_v41, %v3151_v30  ;;  %vm320_vm8 = vcmp.eq.s32.totalorder %v2931_v18, %v3265_v42 }
 0x129   :  { %v1658_v50 = vrot.slane %v1175_v26, %v3136_v11  ;;  %v1663_v51 = vrot.slane %v1176_v27, %v3140_v14  ;;  %v875_v63 = vpack.c.bf16 %v766_v52, %v764_v9 }
 0x12b   :  { %v1659_v56 = vsel %vm1237_vm2, %v1658_v50, %v1654_v55  ;;  %725 = vadd.xlane.f32.xlu1 %v520_v61  ;;  %723 = vadd.xlane.f32.xlu0 %v519_v54  ;;  %v1189_v44 = vunpack.c.l.b16 %v875_v63  ;;  %v1190_v26 = vunpack.c.h.b16 %v875_v63  ;;  %v535_v63 = vsel %vm317_vm10, %v2937_v23, 0.0 }
 0x12c   :  { %v3381_v59 = vsel %vm1244_vm3, %v1663_v51, %v1659_v56  ;;  %v650_v3 = vpop.xlane.xlu1 %649  ;;  %v648_v8 = vpop.xlane.xlu0 %647  ;;  %v536_v51 = vsel %vm318_vm9, %v2937_v23, 0.0  ;;  %vm319_vm9 = vcmp.eq.s32.totalorder %v2931_v18, %v3270_v46  ;;  %vm1279_vm10 = vcmask 589312  }
 0x12d   :  { %v846_v15 = vpack.c.bf16 %v650_v3, %v648_v8  ;;  %v1728_v56 = vrot.slane %v1189_v44, %v3130_v16  ;;  %v1732_v3 = vrot.slane %v1190_v26, %v3133_v4  ;;  %v566_v8 = vsel %vm348_vm11, %v3017_v60, 0.0 }
 0x12e   :  { %v522_v26 = vsel %vm304_vm13, %v2905_v2, 0.0  ;;  %vm1286_vm11 = vcmask 654912   ;;  %vm349_vm13 = vcmp.eq.s32.totalorder %v3012_v57, %v3151_v30 }
 0x12f   :  { %v1131_v33 = vunpack.c.l.b16 %v846_v15  ;;  %v1132_v35 = vunpack.c.h.b16 %v846_v15  ;;  %785 = vadd.xlane.f32.xlu1 %v550_v13  ;;  %783 = vadd.xlane.f32.xlu0 %v549_v21 }
 0x130   :  { %v710_v36 = vpop.xlane.xlu1 %709  ;;  %v708_v49 = vpop.xlane.xlu0 %707 }
 0x131   :  { %v1441_v40 = vrot.slane %v1131_v33, %v3316_v1  ;;  %v1446_v34 = vrot.slane %v1132_v35, %v3321_v19  ;;  %v861_v43 = vpack.c.bf16 %v710_v36, %v708_v49  ;;  %v1274_v49 = vadd.s32 4294967232, %v2763_v6 }
 0x133   :  { %v1442_v27 = vsel %vm1265_vm6, %v1441_v40, %v3298_v24  ;;  %v1161_v52 = vunpack.c.l.b16 %v861_v43  ;;  %v1162_v9 = vunpack.c.h.b16 %v861_v43  ;;  %697 = vadd.xlane.f32.xlu1 %v506_v37  ;;  %695 = vadd.xlane.f32.xlu0 %v505_v38  ;;  %v1281_v37 = vadd.s32 4294967224, %v2763_v6  ;;  %v3433_v43 = vld [vmem:[#allocation8] sm:$0xff] }
 0x134   :  { %v3402_v61 = vsel %vm1272_vm7, %v1446_v34, %v1442_v27  ;;  %v770_v54 = vpop.xlane.xlu1 %769  ;;  %v768_v50 = vpop.xlane.xlu0 %767  ;;  %v1733_v34 = vsel %vm1230_vm1, %v1732_v3, %v1728_v56  ;;  %v552_v3 = vsel %vm334_vm4, %v2983_v45, 0.0  ;;  %vm335_vm4 = vcmp.eq.s32.totalorder %v2978_v41, %v3270_v46 }
 0x135   :  { %v1589_v24 = vrot.slane %v1161_v52, %v3216_v17  ;;  %v1594_v55 = vrot.slane %v1162_v9, %v3221_v25  ;;  %v876_v31 = vpack.c.bf16 %v770_v54, %v768_v50  ;;  %v3441_v9 = vsub.s32 %v1274_v49, %v2765_v7 }
 0x136   :  { %v3444_v54 = vsub.s32 %v1281_v37, %v2765_v7  ;;  %v521_v50 = vsel %vm303_vm0, %v2905_v2, 0.0  ;;  %vm336_vm0 = vcmp.eq.s32.totalorder %v2978_v41, %v3265_v42  ;;  %v553_v28 = vsel %vm335_vm4, %v2983_v45, 0.0 }
 0x137   :  { %v1590_v13 = vsel %vm1251_vm14, %v1589_v24, %v3313_v58  ;;  %v1191_v21 = vunpack.c.l.b16 %v876_v31  ;;  %v1192_v15 = vunpack.c.h.b16 %v876_v31  ;;  %757 = vadd.xlane.f32.xlu1 %v536_v51  ;;  %755 = vadd.xlane.f32.xlu0 %v535_v63  ;;  %v898_v63 = vrot.slane %v3433_v43, %v2772_v10 }
 0x138   :  { %v3420_v33 = vsel %vm1258_vm15, %v1594_v55, %v1590_v13  ;;  %v798_v35 = vpop.xlane.xlu1 %797  ;;  %v796_v36 = vpop.xlane.xlu0 %795 }
 0x139   :  { %v1737_v58 = vrot.slane %v1191_v21, %v3136_v11  ;;  %v1742_v38 = vrot.slane %v1192_v15, %v3140_v14  ;;  %v3428_v40 = vpack.c.bf16 %v798_v35, %v796_v36  ;;  %v538_v35 = vsel %vm320_vm8, %v2937_v23, 0.0 }
 0x13a   :  { %v537_v36 = vsel %vm319_vm9, %v2937_v23, 0.0  ;;  %vm351_vm8 = vcmp.eq.s32.totalorder %v3012_v57, %v3270_v46 }
 0x13b   :  { %v1738_v44 = vsel %vm1237_vm2, %v1737_v58, %v1733_v34  ;;  %817 = vadd.xlane.f32.xlu1 %v566_v8  ;;  %815 = vadd.xlane.f32.xlu0 %v565_v32  ;;  %v551_v8 = vsel %vm333_vm5, %v2983_v45, 0.0  ;;  %v906_v32 = vcombine.high %v898_v63, %v898_v63  ;;  %vm352_vm5 = vcmp.eq.s32.totalorder %v3012_v57, %v3265_v42 }
 0x13c   :  { %v3438_v27 = vsel %vm1244_vm3, %v1742_v38, %v1738_v44  ;;  %v590_v52 = vpop.xlane.xlu1 %589  ;;  %v588_v62 = vpop.xlane.xlu0 %587 }
 0x13d   :  { %v831_v51 = vpack.c.bf16 %v590_v52, %v588_v62  ;;  %v928_v30 = vrot.slane %v906_v32, %v2772_v10  ;;  %v568_v62 = vsel %vm350_vm12, %v3017_v60, 0.0 }
 0x13f   :  { %v1101_v24 = vunpack.c.l.b16 %v831_v51  ;;  %v1102_v55 = vunpack.c.h.b16 %v831_v51  ;;  %729 = vadd.xlane.f32.xlu1 %v522_v26  ;;  %727 = vadd.xlane.f32.xlu0 %v521_v50  ;;  %v567_v50 = vsel %vm349_vm13, %v3017_v60, 0.0 }
 0x140   :  { %v622_v31 = vpop.xlane.xlu1 %621  ;;  %v620_v56 = vpop.xlane.xlu0 %619 }
 0x141   :  { %v1278_v13 = vrot.slane %v1101_v24, %v3441_v9  ;;  %v1285_v21 = vrot.slane %v1102_v55, %v3444_v54  ;;  %v839_v15 = vpack.c.bf16 %v622_v31, %v620_v56 }
 0x143   :  { %v1280_v18 = vsel %vm1279_vm10, %v1278_v13, %v3338_v53  ;;  %v1117_v49 = vunpack.c.l.b16 %v839_v15  ;;  %v1118_v37 = vunpack.c.h.b16 %v839_v15  ;;  %789 = vadd.xlane.f32.xlu1 %v552_v3  ;;  %787 = vadd.xlane.f32.xlu0 %v551_v8  ;;  %v891_v53 = vcombine.high %v3433_v43, %v3433_v43  ;;  %v2499_v13 = vld [vmem:[#allocation10 + $0x38] sm:$0xff]  }
 0x144   :  { %v3470_v58 = vsel %vm1286_vm11, %v1285_v21, %v1280_v18  ;;  %v682_v38 = vpop.xlane.xlu1 %681  ;;  %v680_v34 = vpop.xlane.xlu0 %679  ;;  %v554_v43 = vsel %vm336_vm0, %v2983_v45, 0.0  ;;  %v914_v8 = vrot.slane %v898_v63, %v2772_v10  ;;  %v1206_v18 = vunpack.c.h.b16 %v3428_v40  ;;  %2418 = vmatpush3.bf16.msra.mxu0 %v2499_v13 }
 0x145   :  { %v1372_v44 = vrot.slane %v1117_v49, %v3441_v9  ;;  %v1377_v26 = vrot.slane %v1118_v37, %v3444_v54  ;;  %v854_v52 = vpack.c.bf16 %v682_v38, %v680_v34  ;;  %v938_v37 = vcombine.high %v928_v30, %v928_v30  ;;  %2419 = vmatprep.subr.bf16.mxu0 %v2675_v5 }
 0x146   :  { %v936_v49 = vcombine.high %v914_v8, %v914_v8 }
 0x147   :  { %v1373_v51 = vsel %vm1279_vm10, %v1372_v44, %v3353_v20  ;;  %v1147_v24 = vunpack.c.l.b16 %v854_v52  ;;  %v1148_v55 = vunpack.c.h.b16 %v854_v52  ;;  %761 = vadd.xlane.f32.xlu1 %v538_v35  ;;  %759 = vadd.xlane.f32.xlu0 %v537_v36  ;;  %v905_v20 = vrot.slane %v891_v53, %v2772_v10 }
 0x148   :  { %v3490_v31 = vsel %vm1286_vm11, %v1377_v26, %v1373_v51  ;;  %v742_v56 = vpop.xlane.xlu1 %741  ;;  %v740_v3 = vpop.xlane.xlu0 %739  ;;  %v947_v35 = vrot.slane %v928_v30, %v2778_v12  ;;  %v1205_v36 = vunpack.c.l.b16 %v3428_v40  ;;  %v943_v40 = vrot.slane %v914_v8, %v2778_v12 }
 0x149   :  { %v1520_v21 = vrot.slane %v1147_v24, %v3316_v1  ;;  %v1525_v15 = vrot.slane %v1148_v55, %v3321_v19  ;;  %v869_v32 = vpack.c.bf16 %v742_v56, %v740_v3  ;;  %v907_v26 = vcombine.high %v905_v20, %v905_v20 }
 0x14a   :  { %vm3517_vm9 = vcmp.eq.s32.totalorder %v947_v35, %v2765_v7  ;;  %v1807_v51 = vrot.slane %v1205_v36, %v3130_v16  ;;  %v1811_v24 = vrot.slane %v1206_v18, %v3133_v4  ;;  %v951_v55 = vrot.slane %v936_v49, %v2778_v12 }
 0x14b   :  { %v1521_v41 = vsel %vm1265_vm6, %v1520_v21, %v3368_v47  ;;  %v1177_v63 = vunpack.c.l.b16 %v869_v32  ;;  %v1178_v38 = vunpack.c.h.b16 %v869_v32  ;;  %821 = vadd.xlane.f32.xlu1 %v568_v62  ;;  %819 = vadd.xlane.f32.xlu0 %v567_v50  ;;  %v2500_v47 = vld [vmem:[#allocation10 + $0x30] sm:$0xff]   ;;  %v955_v56 = vrot.slane %v938_v37, %v2778_v12 }
 0x14c   :  { %v3508_v34 = vsel %vm1272_vm7, %v1525_v15, %v1521_v41  ;;  %v802_v53 = vpop.xlane.xlu1 %801  ;;  %v800_v44 = vpop.xlane.xlu0 %799  ;;  %2420 = vmatpush3.bf16.msra.mxu0 %v2500_v47  ;;  %v921_v21 = vrot.slane %v905_v20, %v2772_v10  ;;  %v570_v4 = vsel %vm352_vm5, %v3017_v60, 0.0  ;;  %vm3544_vm12 = vcmp.eq.s32.totalorder %v943_v40, %v2765_v7 }
 0x14d   :  { %v1668_v52 = vrot.slane %v1177_v63, %v3216_v17  ;;  %v1673_v30 = vrot.slane %v1178_v38, %v3221_v25  ;;  %v884_v62 = vpack.c.bf16 %v802_v53, %v800_v44  ;;  %2421 = vmatprep.subr.bf16.mxu0 %v2675_v5  ;;  %v1812_v42 = vsel %vm1230_vm1, %v1811_v24, %v1807_v51  ;;  %v2502_v44 = vld [vmem:[#allocation10 + $0x20] sm:$0xff]  }
 0x14e   :  { %v981_v57 = vsel %vm3517_vm9, %v2815_v29, 0.0  ;;  %vm974_vm13 = vcmp.eq.s32.totalorder %v951_v55, %v2765_v7  ;;  %vm975_vm0 = vcmp.eq.s32.totalorder %v955_v56, %v2765_v7  ;;  %v959_v46 = vrot.slane %v921_v21, %v2778_v12 }
 0x14f   :  { %v1669_v3 = vsel %vm1251_vm14, %v1668_v52, %v3381_v59  ;;  %v1207_v8 = vunpack.c.l.b16 %v884_v62  ;;  %v1208_v13 = vunpack.c.h.b16 %v884_v62  ;;  %793 = vadd.xlane.f32.xlu1 %v554_v43  ;;  %791 = vadd.xlane.f32.xlu0 %v553_v28  ;;  %v569_v59 = vsel %vm351_vm8, %v3017_v60, 0.0  ;;  %v2501_v28 = vld [vmem:[#allocation10 + $0x28] sm:$0xff]  }
 0x150   :  { %v3529_v15 = vsel %vm1258_vm15, %v1673_v30, %v1669_v3  ;;  %v654_v32 = vpop.xlane.xlu1 %653  ;;  %v652_v35 = vpop.xlane.xlu0 %651  ;;  %v935_v43 = vrot.slane %v907_v26, %v2772_v10  ;;  %2422 = vmatpush3.bf16.msra.mxu0 %v2501_v28  ;;  %v980_v29 = vsel %vm3544_vm12, %v2796_v22, 0.0  ;;  %v937_v53 = vcombine.high %v921_v21, %v921_v21 }
 0x151   :  { %v1816_v20 = vrot.slane %v1207_v8, %v3136_v11  ;;  %v1821_v36 = vrot.slane %v1208_v13, %v3140_v14  ;;  %v847_v18 = vpack.c.bf16 %v654_v32, %v652_v35  ;;  %2423 = vmatprep.subr.bf16.mxu0 %v2675_v5  ;;  %v982_v30 = vsel %vm974_vm13, %v2837_v39, 0.0  ;;  %v2503_v13 = vld [vmem:[#allocation10 + $0x18] sm:$0xff]  }
 0x152   :  { %v963_v38 = vrot.slane %v935_v43, %v2778_v12  ;;  %v939_v52 = vcombine.high %v935_v43, %v935_v43  ;;  %v983_v22 = vsel %vm975_vm0, %v2857_v48, 0.0  ;;  %v1288_v62 = vadd.s32 4294967216, %v2763_v6 }
 0x153   :  { %v1817_v10 = vsel %vm1237_vm2, %v1816_v20, %v1812_v42  ;;  %v1133_v11 = vunpack.c.l.b16 %v847_v18  ;;  %v1134_v14 = vunpack.c.h.b16 %v847_v18  ;;  %825 = vadd.xlane.f32.xlu1 %v570_v4  ;;  %823 = vadd.xlane.f32.xlu0 %v569_v59  ;;  %vm3576_vm1 = vcmp.eq.s32.totalorder %v959_v46, %v2765_v7 }
 0x154   :  { %v3557_v37 = vsel %vm1244_vm3, %v1821_v36, %v1817_v10  ;;  %v714_v41 = vpop.xlane.xlu1 %713  ;;  %v712_v63 = vpop.xlane.xlu0 %711  ;;  %2424 = vmatpush3.bf16.msra.mxu0 %v2502_v44  ;;  %v1295_v56 = vadd.s32 4294967208, %v2763_v6  ;;  %vm3585_vm2 = vcmp.eq.s32.totalorder %v963_v38, %v2765_v7  ;;  %v971_v4 = vrot.slane %v939_v52, %v2778_v12  ;;  %v2505_v44 = vld [vmem:[#allocation10 + $0x8] sm:$0xff]  }
 0x155   :  { %v1451_v40 = vrot.slane %v1133_v11, %v3441_v9  ;;  %v1456_v26 = vrot.slane %v1134_v14, %v3444_v54  ;;  %v862_v47 = vpack.c.bf16 %v714_v41, %v712_v63  ;;  %2425 = vmatprep.subr.bf16.mxu0 %v2675_v5  ;;  %v984_v59 = vsel %vm3576_vm1, %v2905_v2, 0.0 }
 0x156   :  { %v3600_v36 = vsub.s32 %v1288_v62, %v2765_v7  ;;  %v985_v2 = vsel %vm3585_vm2, %v2937_v23, 0.0  ;;  %vm979_vm4 = vcmp.eq.s32.totalorder %v971_v4, %v2765_v7  ;;  %vm1293_vm5 = vcmask 720512   ;;  %v2506_v62 = vld [vmem:[#allocation10] sm:$0xff]  }
 0x157   :  { %v1452_v50 = vsel %vm1279_vm10, %v1451_v40, %v3402_v61  ;;  %v1163_v51 = vunpack.c.l.b16 %v862_v47  ;;  %v1164_v24 = vunpack.c.h.b16 %v862_v47  ;;  %990 = vadd.xlane.f32.xlu1 %v981_v57  ;;  %988 = vadd.xlane.f32.xlu0 %v980_v29  ;;  %v967_v61 = vrot.slane %v937_v53, %v2778_v12 }
 0x158   :  { %v3581_v39 = vsel %vm1286_vm11, %v1456_v26, %v1452_v50  ;;  %v774_v55 = vpop.xlane.xlu1 %773  ;;  %v772_v48 = vpop.xlane.xlu0 %771  ;;  %2426 = vmatpush3.bf16.msra.mxu0 %v2503_v13  ;;  %v3606_v12 = vsub.s32 %v1295_v56, %v2765_v7  ;;  %v987_v53 = vsel %vm979_vm4, %v3017_v60, 0.0  ;;  %vm1300_vm8 = vcmask 786112  }
 0x159   :  { %v1599_v21 = vrot.slane %v1163_v51, %v3316_v1  ;;  %v1604_v32 = vrot.slane %v1164_v24, %v3321_v19  ;;  %v877_v35 = vpack.c.bf16 %v774_v55, %v772_v48  ;;  %vm978_vm3 = vcmp.eq.s32.totalorder %v967_v61, %v2765_v7  ;;  %2427 = vmatprep.subr.bf16.mxu0 %v2675_v5 }
 0x15a   :  { %v986_v38 = vsel %vm978_vm3, %v2983_v45, 0.0  ;;  %vm2676_vm9 = vmmov 0   ;;  %vm2051_vm12 = vcmask 1043456   ;;  %vm1883_vm13 = vcmask 1041409  }
 0x15b   :  { %v1600_v43 = vsel %vm1265_vm6, %v1599_v21, %v3420_v33  ;;  %v1193_v28 = vunpack.c.l.b16 %v877_v35  ;;  %v1194_v20 = vunpack.c.h.b16 %v877_v35  ;;  %992 = vadd.xlane.f32.xlu0 %v982_v30  ;;  %994 = vadd.xlane.f32.xlu1 %v983_v22  ;;  %v2504_v33 = vld [vmem:[#allocation10 + $0x10] sm:$0xff]   ;;  %vm1885_vm0 = vcmask 1042434  }
 0x15c   :  { %v3603_v18 = vsel %vm1272_vm7, %v1604_v32, %v1600_v43  ;;  %v594_v49 = vpop.xlane.xlu1 %593  ;;  %v592_v42 = vpop.xlane.xlu0 %591  ;;  %2428 = vmatpush3.bf16.msra.mxu0 %v2504_v33  ;;  %2433 = vmatprep.mubr.msk.bf16.mxu0 %vm2676_vm9, %v2675_v5  ;;  %vm1887_vm1 = vcmask 1043459   ;;  %vm1889_vm2 = vcmask 1044484   ;;  %vm1891_vm3 = vcmask 1045509  }
 0x15d   :  { %v1747_v57 = vrot.slane %v1193_v28, %v3216_v17  ;;  %v1752_v10 = vrot.slane %v1194_v20, %v3221_v25  ;;  %v832_v11 = vpack.c.bf16 %v594_v49, %v592_v42  ;;  %2429 = vmatprep.subr.bf16.mxu0 %v2675_v5  ;;  %2439 = vmatprep.mubr.msk.bf16.mxu1 %vm2676_vm9, %v2675_v5  ;;  %vm2047_vm4 = vcmask 64512  }
 0x15f   :  { %v1748_v14 = vsel %vm1251_vm14, %v1747_v57, %v3438_v27  ;;  %v1103_v46 = vunpack.c.l.b16 %v832_v11  ;;  %v1104_v41 = vunpack.c.h.b16 %v832_v11  ;;  %996 = vadd.xlane.f32.xlu0 %v984_v59  ;;  %998 = vadd.xlane.f32.xlu1 %v985_v2 }
 0x160   :  { %v3619_v23 = vsel %vm1258_vm15, %v1752_v10, %v1748_v14  ;;  %v626_v63 = vpop.xlane.xlu1 %625  ;;  %v624_v29 = vpop.xlane.xlu0 %623  ;;  %2430 = vmatpush3.bf16.msra.mxu0 %v2505_v44 }
 0x161   :  { %v1292_v27 = vrot.slane %v1103_v46, %v3600_v36  ;;  %v1299_v40 = vrot.slane %v1104_v41, %v3606_v12  ;;  %v840_v26 = vpack.c.bf16 %v626_v63, %v624_v29  ;;  %2431 = vmatprep.subr.bf16.mxu0 %v2675_v5 }
 0x163   :  { %v1294_v47 = vsel %vm1293_vm5, %v1292_v27, %v3470_v58  ;;  %v1119_v52 = vunpack.c.l.b16 %v840_v26  ;;  %v1120_v30 = vunpack.c.h.b16 %v840_v26  ;;  %1000 = vadd.xlane.f32.xlu0 %v986_v38  ;;  %1002 = vadd.xlane.f32.xlu1 %v987_v53 }
 0x164   :  { %v3631_v45 = vsel %vm1300_vm8, %v1299_v40, %v1294_v47  ;;  %v686_v60 = vpop.xlane.xlu1 %685  ;;  %v684_v22 = vpop.xlane.xlu0 %683  ;;  %2432 = vmatpush3.bf16.msra.mxu0 %v2506_v62 }
 0x165   :  { %v1382_v50 = vrot.slane %v1119_v52, %v3600_v36  ;;  %v1387_v51 = vrot.slane %v1120_v30, %v3606_v12  ;;  %v855_v24 = vpack.c.bf16 %v686_v60, %v684_v22  ;;  %v1302_v60 = vadd.s32 4294967200, %v2763_v6 }
 0x167   :  { %v1383_v58 = vsel %vm1293_vm5, %v1382_v50, %v3490_v31  ;;  %v1149_v3 = vunpack.c.l.b16 %v855_v24  ;;  %v1150_v55 = vunpack.c.h.b16 %v855_v24 }
 0x168   :  { %v3639_v48 = vsel %vm1300_vm8, %v1387_v51, %v1383_v58  ;;  %v746_v56 = vpop.xlane.xlu1 %745  ;;  %v744_v8 = vpop.xlane.xlu0 %743  ;;  %v1309_v51 = vadd.s32 4294967192, %v2763_v6 }
 0x169   :  { %v1530_v61 = vrot.slane %v1149_v3, %v3441_v9  ;;  %v1535_v13 = vrot.slane %v1150_v55, %v3444_v54  ;;  %v870_v21 = vpack.c.bf16 %v746_v56, %v744_v8  ;;  %v3684_v56 = vsub.s32 %v1302_v60, %v2765_v7 }
 0x16b   :  { %v1531_v31 = vsel %vm1279_vm10, %v1530_v61, %v3508_v34  ;;  %v1179_v32 = vunpack.c.l.b16 %v870_v21  ;;  %v1180_v35 = vunpack.c.h.b16 %v870_v21  ;;  %v3689_v21 = vsub.s32 %v1309_v51, %v2765_v7 }
 0x16c   :  { %v3648_v4 = vsel %vm1286_vm11, %v1535_v13, %v1531_v31  ;;  %v806_v59 = vpop.xlane.xlu1 %805  ;;  %v804_v43 = vpop.xlane.xlu0 %803 }
 0x16d   :  { %v1678_v28 = vrot.slane %v1179_v32, %v3316_v1  ;;  %v1683_v20 = vrot.slane %v1180_v35, %v3321_v19  ;;  %v885_v5 = vpack.c.bf16 %v806_v59, %v804_v43 }
 0x16f   :  { %v1679_v49 = vsel %vm1265_vm6, %v1678_v28, %v3529_v15  ;;  %v1209_v42 = vunpack.c.l.b16 %v885_v5  ;;  %v1210_v2 = vunpack.c.h.b16 %v885_v5  ;;  %v1990_v15 = vld [vmem:[%s3890_s4] sm:$0xf] }
 0x170   :  { %v3655_v33 = vsel %vm1272_vm7, %v1683_v20, %v1679_v49  ;;  %v658_v34 = vpop.xlane.xlu1 %657  ;;  %v656_v57 = vpop.xlane.xlu0 %655  ;;  %v2053_v44 = vsel %vm2051_vm12, %v1990_v15, 0 }
 0x171   :  { %v1826_v10 = vrot.slane %v1209_v42, %v3216_v17  ;;  %v1831_v11 = vrot.slane %v1210_v2, %v3221_v25  ;;  %v848_v14 = vpack.c.bf16 %v658_v34, %v656_v57  ;;  %2438 = vmatpush3.bf16.msra.mxu1 %v2053_v44 }
 0x173   :  { %v1827_v46 = vsel %vm1251_vm14, %v1826_v10, %v3557_v37  ;;  %v1135_v41 = vunpack.c.l.b16 %v848_v14  ;;  %v1136_v63 = vunpack.c.h.b16 %v848_v14  ;;  %vm1307_vm14 = vcmask 851712  }
 0x174   :  { %v3665_v29 = vsel %vm1258_vm15, %v1831_v11, %v1827_v46  ;;  %v718_v38 = vpop.xlane.xlu1 %717  ;;  %v716_v53 = vpop.xlane.xlu0 %715  ;;  %vm1314_vm15 = vcmask 917312  }
 0x175   :  { %v1461_v17 = vrot.slane %v1135_v41, %v3600_v36  ;;  %v1466_v25 = vrot.slane %v1136_v63, %v3606_v12  ;;  %v863_v27 = vpack.c.bf16 %v718_v38, %v716_v53 }
 0x177   :  { %v1462_v37 = vsel %vm1293_vm5, %v1461_v17, %v3581_v39  ;;  %v1165_v40 = vunpack.c.l.b16 %v863_v27  ;;  %v1166_v26 = vunpack.c.h.b16 %v863_v27 }
 0x178   :  { %v3672_v47 = vsel %vm1300_vm8, %v1466_v25, %v1462_v37  ;;  %v778_v52 = vpop.xlane.xlu1 %777  ;;  %v776_v30 = vpop.xlane.xlu0 %775 }
 0x179   :  { %v1609_v22 = vrot.slane %v1165_v40, %v3441_v9  ;;  %v1614_v62 = vrot.slane %v1166_v26, %v3444_v54  ;;  %v878_v50 = vpack.c.bf16 %v778_v52, %v776_v30 }
 0x17b   :  { %v1610_v24 = vsel %vm1279_vm10, %v1609_v22, %v3603_v18  ;;  %v1195_v39 = vunpack.c.l.b16 %v878_v50  ;;  %v1196_v58 = vunpack.c.h.b16 %v878_v50 }
 0x17c   :  { %v3681_v3 = vsel %vm1286_vm11, %v1614_v62, %v1610_v24  ;;  %v598_v55 = vpop.xlane.xlu1 %597  ;;  %v596_v8 = vpop.xlane.xlu0 %595 }
 0x17d   :  { %v1757_v61 = vrot.slane %v1195_v39, %v3316_v1  ;;  %v1762_v13 = vrot.slane %v1196_v58, %v3321_v19  ;;  %v833_v31 = vpack.c.bf16 %v598_v55, %v596_v8 }
 0x17f   :  { %v1758_v18 = vsel %vm1265_vm6, %v1757_v61, %v3619_v23  ;;  %v1105_v32 = vunpack.c.l.b16 %v833_v31  ;;  %v1106_v35 = vunpack.c.h.b16 %v833_v31 }
 0x180   :  { %v3694_v59 = vsel %vm1272_vm7, %v1762_v13, %v1758_v18  ;;  %v630_v43 = vpop.xlane.xlu1 %629  ;;  %v628_v28 = vpop.xlane.xlu0 %627 }
 0x181   :  { %v1306_v20 = vrot.slane %v1105_v32, %v3684_v56  ;;  %v1313_v5 = vrot.slane %v1106_v35, %v3689_v21  ;;  %v841_v49 = vpack.c.bf16 %v630_v43, %v628_v28 }
 0x183   :  { %v1308_v42 = vsel %vm1307_vm14, %v1306_v20, %v3631_v45  ;;  %v1121_v2 = vunpack.c.l.b16 %v841_v49  ;;  %v1122_v34 = vunpack.c.h.b16 %v841_v49 }
 0x184   :  { %v3701_v23 = vsel %vm1314_vm15, %v1313_v5, %v1308_v42  ;;  %v690_v57 = vpop.xlane.xlu1 %689  ;;  %v688_v10 = vpop.xlane.xlu0 %687 }
 0x185   :  { %v1392_v11 = vrot.slane %v1121_v2, %v3684_v56  ;;  %v1397_v14 = vrot.slane %v1122_v34, %v3689_v21  ;;  %v856_v46 = vpack.c.bf16 %v690_v57, %v688_v10  ;;  %v1316_v34 = vadd.s32 4294967184, %v2763_v6 }
 0x187   :  { %v1393_v41 = vsel %vm1307_vm14, %v1392_v11, %v3639_v48  ;;  %v1151_v63 = vunpack.c.l.b16 %v856_v46  ;;  %v1152_v15 = vunpack.c.h.b16 %v856_v46  ;;  %v1323_v11 = vadd.s32 4294967176, %v2763_v6 }
 0x188   :  { %v3708_v38 = vsel %vm1314_vm15, %v1397_v14, %v1393_v41  ;;  %v750_v45 = vpop.xlane.xlu1 %749  ;;  %v748_v53 = vpop.xlane.xlu0 %747  ;;  %v3750_v46 = vsub.s32 %v1316_v34, %v2765_v7 }
 0x189   :  { %v1540_v44 = vrot.slane %v1151_v63, %v3600_v36  ;;  %v1545_v17 = vrot.slane %v1152_v15, %v3606_v12  ;;  %v871_v25 = vpack.c.bf16 %v750_v45, %v748_v53  ;;  %v3753_v15 = vsub.s32 %v1323_v11, %v2765_v7 }
 0x18b   :  { %v1541_v27 = vsel %vm1293_vm5, %v1540_v44, %v3648_v4  ;;  %v1181_v37 = vunpack.c.l.b16 %v871_v25  ;;  %v1182_v40 = vunpack.c.h.b16 %v871_v25 }
 0x18c   :  { %v3715_v26 = vsel %vm1300_vm8, %v1545_v17, %v1541_v27  ;;  %v810_v48 = vpop.xlane.xlu1 %809  ;;  %v808_v52 = vpop.xlane.xlu0 %807 }
 0x18d   :  { %v1688_v30 = vrot.slane %v1181_v37, %v3441_v9  ;;  %v1693_v60 = vrot.slane %v1182_v40, %v3444_v54  ;;  %v886_v22 = vpack.c.bf16 %v810_v48, %v808_v52 }
 0x18f   :  { %v1689_v62 = vsel %vm1279_vm10, %v1688_v30, %v3655_v33  ;;  %v1211_v50 = vunpack.c.l.b16 %v886_v22  ;;  %v1212_v51 = vunpack.c.h.b16 %v886_v22 }
 0x190   :  { %v3722_v24 = vsel %vm1286_vm11, %v1693_v60, %v1689_v62  ;;  %v662_v4 = vpop.xlane.xlu1 %661  ;;  %v660_v39 = vpop.xlane.xlu0 %659 }
 0x191   :  { %v1836_v58 = vrot.slane %v1211_v50, %v3316_v1  ;;  %v1841_v55 = vrot.slane %v1212_v51, %v3321_v19  ;;  %v849_v8 = vpack.c.bf16 %v662_v4, %v660_v39 }
 0x193   :  { %v1837_v61 = vsel %vm1265_vm6, %v1836_v58, %v3665_v29  ;;  %v1137_v13 = vunpack.c.l.b16 %v849_v8  ;;  %v1138_v31 = vunpack.c.h.b16 %v849_v8  ;;  %vm1321_vm6 = vcmask 982912  }
 0x194   :  { %v3729_v18 = vsel %vm1272_vm7, %v1841_v55, %v1837_v61  ;;  %v722_v33 = vpop.xlane.xlu1 %721  ;;  %v720_v32 = vpop.xlane.xlu0 %719  ;;  %vm1328_vm7 = vcmask 1048512  }
 0x195   :  { %v1471_v35 = vrot.slane %v1137_v13, %v3684_v56  ;;  %v1476_v43 = vrot.slane %v1138_v31, %v3689_v21  ;;  %v864_v28 = vpack.c.bf16 %v722_v33, %v720_v32 }
 0x197   :  { %v1472_v1 = vsel %vm1307_vm14, %v1471_v35, %v3672_v47  ;;  %v1167_v19 = vunpack.c.l.b16 %v864_v28  ;;  %v1168_v20 = vunpack.c.h.b16 %v864_v28 }
 0x198   :  { %v1477_v5 = vsel %vm1314_vm15, %v1476_v43, %v1472_v1  ;;  %v3736_v29 = vpop.xlane.xlu1 %781  ;;  %v3738_v49 = vpop.xlane.xlu0 %779 }
 0x199   :  { %v1619_v42 = vrot.slane %v1167_v19, %v3600_v36  ;;  %v1624_v2 = vrot.slane %v1168_v20, %v3606_v12 }
 0x19b   :  { %v1620_v57 = vsel %vm1293_vm5, %v1619_v42, %v3681_v3 }
 0x19c   :  { %v3746_v10 = vsel %vm1300_vm8, %v1624_v2, %v1620_v57  ;;  %v602_v47 = vpop.xlane.xlu1 %601  ;;  %v600_v14 = vpop.xlane.xlu0 %599 }
 0x19d   :  { %v834_v41 = vpack.c.bf16 %v602_v47, %v600_v14 }
 0x19f   :  { %v1107_v63 = vunpack.c.l.b16 %v834_v41  ;;  %v1108_v45 = vunpack.c.h.b16 %v834_v41 }
 0x1a0   :  { %v634_v53 = vpop.xlane.xlu1 %633  ;;  %v632_v44 = vpop.xlane.xlu0 %631 }
 0x1a1   :  { %v1320_v3 = vrot.slane %v1107_v63, %v3750_v46  ;;  %v842_v17 = vpack.c.bf16 %v634_v53, %v632_v44  ;;  %v1327_v6 = vrot.slane %v1108_v45, %v3753_v15 }
 0x1a3   :  { %v1123_v25 = vunpack.c.l.b16 %v842_v17  ;;  %v1124_v27 = vunpack.c.h.b16 %v842_v17  ;;  %v1322_v48 = vsel %vm1321_vm6, %v1320_v3, %v3701_v23 }
 0x1a4   :  { %v694_v37 = vpop.xlane.xlu1 %693  ;;  %v692_v40 = vpop.xlane.xlu0 %691  ;;  %v1329_v60 = vsel %vm1328_vm7, %v1327_v6, %v1322_v48 }
 0x1a5   :  { %v1402_v7 = vrot.slane %v1123_v25, %v3750_v46  ;;  %v1407_v52 = vrot.slane %v1124_v27, %v3753_v15  ;;  %v857_v8 = vpack.c.bf16 %v694_v37, %v692_v40  ;;  %v879_v37 = vpack.c.bf16 %v3736_v29, %v3738_v49 }
 0x1a7   :  { %v1403_v30 = vsel %vm1321_vm6, %v1402_v7, %v3708_v38  ;;  %v1153_v35 = vunpack.c.l.b16 %v857_v8  ;;  %v1154_v42 = vunpack.c.h.b16 %v857_v8 }
 0x1a8   :  { %v1408_v22 = vsel %vm1328_vm7, %v1407_v52, %v1403_v30  ;;  %v754_v62 = vpop.xlane.xlu1 %753  ;;  %v752_v50 = vpop.xlane.xlu0 %751 }
 0x1a9   :  { %v1884_v51 = vsel %vm1883_vm13, %v1408_v22, %v1329_v60  ;;  %v1550_v2 = vrot.slane %v1153_v35, %v3684_v56  ;;  %v1555_v11 = vrot.slane %v1154_v42, %v3689_v21  ;;  %v872_v25 = vpack.c.bf16 %v754_v62, %v752_v50 }
 0x1ab   :  { %v1551_v14 = vsel %vm1307_vm14, %v1550_v2, %v3715_v26  ;;  %v1183_v52 = vunpack.c.l.b16 %v872_v25 }
 0x1ac   :  { %v814_v4 = vpop.xlane.xlu1 %813  ;;  %v812_v39 = vpop.xlane.xlu0 %811  ;;  %v1556_v17 = vsel %vm1314_vm15, %v1555_v11, %v1551_v14 }
 0x1ad   :  { %v887_v62 = vpack.c.bf16 %v814_v4, %v812_v39  ;;  %v1698_v29 = vrot.slane %v1183_v52, %v3600_v36 }
 0x1af   :  { %v1213_v35 = vunpack.c.l.b16 %v887_v62  ;;  %v1214_v14 = vunpack.c.h.b16 %v887_v62 }
 0x1b0   :  { %v666_v58 = vpop.xlane.xlu1 %665  ;;  %v664_v23 = vpop.xlane.xlu0 %663 }
 0x1b1   :  { %v850_v55 = vpack.c.bf16 %v666_v58, %v664_v23  ;;  %v1198_v23 = vunpack.c.h.b16 %v879_v37  ;;  %v1851_v52 = vrot.slane %v1214_v14, %v3444_v54 }
 0x1b3   :  { %v1139_v61 = vunpack.c.l.b16 %v850_v55  ;;  %v1140_v13 = vunpack.c.h.b16 %v850_v55 }
 0x1b4   :  { %v726_v31 = vpop.xlane.xlu1 %725  ;;  %v724_v33 = vpop.xlane.xlu0 %723 }
 0x1b5   :  { %v1481_v38 = vrot.slane %v1139_v61, %v3750_v46  ;;  %v1486_v32 = vrot.slane %v1140_v13, %v3753_v15  ;;  %v865_v41 = vpack.c.bf16 %v726_v31, %v724_v33  ;;  %v1184_v61 = vunpack.c.h.b16 %v872_v25 }
 0x1b7   :  { %v1482_v43 = vsel %vm1321_vm6, %v1481_v38, %v1477_v5  ;;  %v1169_v27 = vunpack.c.l.b16 %v865_v41  ;;  %v1170_v30 = vunpack.c.h.b16 %v865_v41  ;;  %v1846_v41 = vrot.slane %v1213_v35, %v3441_v9 }
 0x1b8   :  { %v1487_v28 = vsel %vm1328_vm7, %v1486_v32, %v1482_v43  ;;  %v786_v1 = vpop.xlane.xlu1 %785  ;;  %v784_v19 = vpop.xlane.xlu0 %783  ;;  %v1772_v43 = vrot.slane %v1198_v23, %v3444_v54 }
 0x1b9   :  { %v1886_v20 = vsel %vm1885_vm0, %v1487_v28, %v1884_v51  ;;  %v1629_v60 = vrot.slane %v1169_v27, %v3684_v56  ;;  %v1197_v51 = vunpack.c.l.b16 %v879_v37  ;;  %v880_v55 = vpack.c.bf16 %v786_v1, %v784_v19 }
 0x1ba   :  { %v1634_v49 = vrot.slane %v1170_v30, %v3689_v21 }
 0x1bb   :  { %v1630_v13 = vsel %vm1307_vm14, %v1629_v60, %v3746_v10  ;;  %v1767_v32 = vrot.slane %v1197_v51, %v3441_v9  ;;  %v1199_v28 = vunpack.c.l.b16 %v880_v55 }
 0x1bc   :  { %v698_v34 = vpop.xlane.xlu1 %697  ;;  %v696_v57 = vpop.xlane.xlu0 %695  ;;  %v1635_v10 = vsel %vm1314_vm15, %v1634_v49, %v1630_v13 }
 0x1bd   :  { %v858_v47 = vpack.c.bf16 %v698_v34, %v696_v57  ;;  %v1699_v34 = vsel %vm1293_vm5, %v1698_v29, %v3722_v24 }
 0x1bf   :  { %v1155_v63 = vunpack.c.l.b16 %v858_v47  ;;  %v1156_v5 = vunpack.c.h.b16 %v858_v47 }
 0x1c0   :  { %v758_v45 = vpop.xlane.xlu1 %757  ;;  %v756_v53 = vpop.xlane.xlu0 %755 }
 0x1c1   :  { %v1560_v44 = vrot.slane %v1155_v63, %v3750_v46  ;;  %v1565_v3 = vrot.slane %v1156_v5, %v3753_v15  ;;  %v873_v22 = vpack.c.bf16 %v758_v45, %v756_v53  ;;  %v1200_v63 = vunpack.c.h.b16 %v880_v55 }
 0x1c3   :  { %v1561_v6 = vsel %vm1321_vm6, %v1560_v44, %v1556_v17  ;;  %v1185_v31 = vunpack.c.l.b16 %v873_v22  ;;  %v1186_v42 = vunpack.c.h.b16 %v873_v22  ;;  %v1768_v44 = vsel %vm1279_vm10, %v1767_v32, %v3694_v59 }
 0x1c4   :  { %v1566_v26 = vsel %vm1328_vm7, %v1565_v3, %v1561_v6  ;;  %v818_v40 = vpop.xlane.xlu1 %817  ;;  %v816_v48 = vpop.xlane.xlu0 %815  ;;  %v1777_v3 = vrot.slane %v1199_v28, %v3600_v36  ;;  %v1847_v59 = vsel %vm1279_vm10, %v1846_v41, %v3729_v18  ;;  %vm1893_vm10 = vcmask 1046534  }
 0x1c5   :  { %v1888_v7 = vsel %vm1887_vm1, %v1566_v26, %v1886_v20  ;;  %v1703_v20 = vrot.slane %v1184_v61, %v3606_v12  ;;  %v888_v2 = vpack.c.bf16 %v818_v40, %v816_v48  ;;  %v1708_v57 = vrot.slane %v1185_v31, %v3684_v56 }
 0x1c6   :  { %v1713_v27 = vrot.slane %v1186_v42, %v3689_v21  ;;  %v1773_v48 = vsel %vm1286_vm11, %v1772_v43, %v1768_v44  ;;  %v1852_v31 = vsel %vm1286_vm11, %v1851_v52, %v1847_v59  ;;  %vm1895_vm11 = vcmask 1047559  }
 0x1c7   :  { %v1704_v25 = vsel %vm1300_vm8, %v1703_v20, %v1699_v34  ;;  %v1215_v6 = vunpack.c.l.b16 %v888_v2  ;;  %v1778_v22 = vsel %vm1293_vm5, %v1777_v3, %v1773_v48  ;;  %v1216_v23 = vunpack.c.h.b16 %v888_v2 }
 0x1c8   :  { %v730_v50 = vpop.xlane.xlu1 %729  ;;  %v728_v58 = vpop.xlane.xlu0 %727  ;;  %v1709_v9 = vsel %vm1307_vm14, %v1708_v57, %v1704_v25 }
 0x1c9   :  { %v866_v8 = vpack.c.bf16 %v730_v50, %v728_v58  ;;  %v1714_v58 = vsel %vm1314_vm15, %v1713_v27, %v1709_v9  ;;  %v1856_v55 = vrot.slane %v1215_v6, %v3600_v36  ;;  %v1861_v36 = vrot.slane %v1216_v23, %v3606_v12 }
 0x1cb   :  { %v1171_v33 = vunpack.c.l.b16 %v866_v8  ;;  %v1172_v38 = vunpack.c.h.b16 %v866_v8  ;;  %v1857_v35 = vsel %vm1293_vm5, %v1856_v55, %v1852_v31 }
 0x1cc   :  { %v790_v4 = vpop.xlane.xlu1 %789  ;;  %v788_v39 = vpop.xlane.xlu0 %787  ;;  %v1862_v57 = vsel %vm1300_vm8, %v1861_v36, %v1857_v35 }
 0x1cd   :  { %v1639_v1 = vrot.slane %v1171_v33, %v3750_v46  ;;  %v1644_v19 = vrot.slane %v1172_v38, %v3753_v15  ;;  %v881_v11 = vpack.c.bf16 %v790_v4, %v788_v39 }
 0x1cf   :  { %v1640_v47 = vsel %vm1321_vm6, %v1639_v1, %v1635_v10  ;;  %v1201_v37 = vunpack.c.l.b16 %v881_v11  ;;  %v1202_v8 = vunpack.c.h.b16 %v881_v11 }
 0x1d0   :  { %v1645_v5 = vsel %vm1328_vm7, %v1644_v19, %v1640_v47  ;;  %v762_v45 = vpop.xlane.xlu1 %761  ;;  %v760_v53 = vpop.xlane.xlu0 %759 }
 0x1d1   :  { %v874_v17 = vpack.c.bf16 %v762_v45, %v760_v53  ;;  %v1890_v24 = vsel %vm1889_vm2, %v1645_v5, %v1888_v7  ;;  %v1782_v7 = vrot.slane %v1200_v63, %v3606_v12  ;;  %v1787_v18 = vrot.slane %v1201_v37, %v3684_v56 }
 0x1d2   :  { %v1792_v4 = vrot.slane %v1202_v8, %v3689_v21 }
 0x1d3   :  { %v1187_v26 = vunpack.c.l.b16 %v874_v17  ;;  %v1188_v40 = vunpack.c.h.b16 %v874_v17  ;;  %v1783_v33 = vsel %vm1300_vm8, %v1782_v7, %v1778_v22 }
 0x1d4   :  { %v822_v30 = vpop.xlane.xlu1 %821  ;;  %v820_v60 = vpop.xlane.xlu0 %819  ;;  %v1788_v43 = vsel %vm1307_vm14, %v1787_v18, %v1783_v33 }
 0x1d5   :  { %v1718_v51 = vrot.slane %v1187_v26, %v3750_v46  ;;  %v1723_v62 = vrot.slane %v1188_v40, %v3753_v15  ;;  %v889_v50 = vpack.c.bf16 %v822_v30, %v820_v60  ;;  %v1793_v12 = vsel %vm1314_vm15, %v1792_v4, %v1788_v43 }
 0x1d7   :  { %v1719_v54 = vsel %vm1321_vm6, %v1718_v51, %v1714_v58  ;;  %v1217_v61 = vunpack.c.l.b16 %v889_v50  ;;  %v1218_v39 = vunpack.c.h.b16 %v889_v50 }
 0x1d8   :  { %v1724_v29 = vsel %vm1328_vm7, %v1723_v62, %v1719_v54  ;;  %v794_v49 = vpop.xlane.xlu1 %793  ;;  %v792_v13 = vpop.xlane.xlu0 %791 }
 0x1d9   :  { %v882_v38 = vpack.c.bf16 %v794_v49, %v792_v13  ;;  %v1892_v32 = vsel %vm1891_vm3, %v1724_v29, %v1890_v24  ;;  %v1866_v28 = vrot.slane %v1217_v61, %v3684_v56  ;;  %v1871_v47 = vrot.slane %v1218_v39, %v3689_v21 }
 0x1db   :  { %v1203_v1 = vunpack.c.l.b16 %v882_v38  ;;  %v1204_v19 = vunpack.c.h.b16 %v882_v38  ;;  %v1867_v11 = vsel %vm1307_vm14, %v1866_v28, %v1862_v57 }
 0x1dc   :  { %v826_v20 = vpop.xlane.xlu1 %825  ;;  %v824_v10 = vpop.xlane.xlu0 %823  ;;  %v1872_v24 = vsel %vm1314_vm15, %v1871_v47, %v1867_v11 }
 0x1dd   :  { %v1797_v42 = vrot.slane %v1203_v1, %v3750_v46  ;;  %v1802_v2 = vrot.slane %v1204_v19, %v3753_v15  ;;  %v890_v34 = vpack.c.bf16 %v826_v20, %v824_v10 }
 0x1df   :  { %v1798_v56 = vsel %vm1321_vm6, %v1797_v42, %v1793_v12  ;;  %v1219_v14 = vunpack.c.l.b16 %v890_v34  ;;  %v1220_v41 = vunpack.c.h.b16 %v890_v34 }
 0x1e0   :  { %v991_v63 = vpop.xlane.xlu1 %990  ;;  %v989_v5 = vpop.xlane.xlu0 %988  ;;  %v1803_v45 = vsel %vm1328_vm7, %v1802_v2, %v1798_v56  ;;  %v1012_v2 = vld [vmem:[#allocation2] sm:$0xff] }
 0x1e1   :  { %v1876_v53 = vrot.slane %v1219_v14, %v3750_v46  ;;  %v1881_v44 = vrot.slane %v1220_v41, %v3753_v15  ;;  %v1005_v3 = vpack.c.bf16 %v991_v63, %v991_v63  ;;  %v1004_v17 = vpack.c.bf16 %v989_v5, %v989_v5 }
 0x1e2   :  { %v1894_v21 = vsel %vm1893_vm10, %v1803_v45, %v1892_v32 }
 0x1e3   :  { %v2000_v25 = vunpack.c.l.b16 %v1005_v3  ;;  %v1999_v27 = vunpack.c.l.b16 %v1004_v17  ;;  %v1877_v6 = vsel %vm1321_vm6, %v1876_v53, %v1872_v24 }
 0x1e4   :  { %v993_v9 = vpop.xlane.xlu0 %992  ;;  %v995_v37 = vpop.xlane.xlu1 %994  ;;  %v1882_v26 = vsel %vm1328_vm7, %v1881_v44, %v1877_v6 }
 0x1e5   :  { %v1006_v40 = vpack.c.bf16 %v993_v9, %v993_v9  ;;  %v1007_v48 = vpack.c.bf16 %v995_v37, %v995_v37  ;;  %v2014_v46 = vrot.slane %v2000_v25, %v3130_v16  ;;  %v2010_v15 = vrot.slane %v1999_v27, %v3130_v16 }
 0x1e6   :  { %v1896_v59 = vsel %vm1895_vm11, %v1882_v26, %v1894_v21 }
 0x1e7   :  { %v2001_v52 = vunpack.c.l.b16 %v1006_v40  ;;  %v2002_v7 = vunpack.c.l.b16 %v1007_v48  ;;  %v1897_v30 = vpack.c.b16 %v1896_v59, %v1896_v59  ;;  %v2039_v58 = vsel %vm1883_vm13, %v2014_v46, %v2010_v15 }
 0x1e8   :  { %v997_v60 = vpop.xlane.xlu0 %996  ;;  %v999_v22 = vpop.xlane.xlu1 %998 }
 0x1e9   :  { %v2018_v51 = vrot.slane %v2001_v52, %v3130_v16  ;;  %2434 = vmatmul.mubr.bf16.vlgmr.msra.gmra.mxu0 %v1897_v30  ;;  %v1008_v62 = vpack.c.bf16 %v997_v60, %v997_v60  ;;  %v1009_v50 = vpack.c.bf16 %v999_v22, %v999_v22  ;;  %v2022_v23 = vrot.slane %v2002_v7, %v3130_v16 }
 0x1eb   :  { %v2040_v55 = vsel %vm1885_vm0, %v2018_v51, %v2039_v58  ;;  %v2003_v8 = vunpack.c.l.b16 %v1008_v62  ;;  %v2004_v18 = vunpack.c.l.b16 %v1009_v50 }
 0x1ec   :  { %v1001_v54 = vpop.xlane.xlu0 %1000  ;;  %v1003_v61 = vpop.xlane.xlu1 %1002  ;;  %v2041_v31 = vsel %vm1887_vm1, %v2022_v23, %v2040_v55 }
 0x1ed   :  { %v2026_v29 = vrot.slane %v2003_v8, %v3130_v16  ;;  %v1010_v49 = vpack.c.bf16 %v1001_v54, %v1001_v54  ;;  %v1011_v13 = vpack.c.bf16 %v1003_v61, %v1003_v61  ;;  %v2030_v33 = vrot.slane %v2004_v18, %v3130_v16 }
 0x1ef   :  { %v2042_v38 = vsel %vm1889_vm2, %v2026_v29, %v2041_v31  ;;  %v2005_v32 = vunpack.c.l.b16 %v1010_v49  ;;  %v2006_v35 = vunpack.c.l.b16 %v1011_v13 }
 0x1f0   :  { %v2043_v39 = vsel %vm1891_vm3, %v2030_v33, %v2042_v38 }
 0x1f1   :  { %v2034_v36 = vrot.slane %v2005_v32, %v3130_v16  ;;  %v2038_v4 = vrot.slane %v2006_v35, %v3130_v16 }
 0x1f3   :  { %v2044_v43 = vsel %vm1893_vm10, %v2034_v36, %v2043_v39 }
 0x1f4   :  { %v2045_v28 = vsel %vm1895_vm11, %v2038_v4, %v2044_v43 }
 0x1f5   :  { %v2046_v1 = vpack.c.b16 %v2045_v28, %v2045_v28 }
 0x1f7   :  { %2440 = vmatmul.mubr.msk.bf16.vlgmr.msra.gmra.mxu1 %vm2047_vm4, %v2046_v1 }
 0x2a9   :  { %v1981_v19 = vpop.f32.mrf.mxu0 }
 0x2aa   :  { %v1987_v34 = vadd.f32 %v1981_v19, %v1012_v2 }
 0x2ab   :  { %v2435_v20 = vpop.f32.mrf.mxu0 }
 0x2ad   :  { %v1984_v10 = vpop.f32.mrf.mxu0 }
 0x2af   :  { %v2436_v42 = vpop.f32.mrf.mxu0 }
 0x2b7   :  { %v2089_v57 = vpop.f32.mrf.mxu1 }
 0x2b8   :  { %v2095_v12 = vadd.f32 %v2089_v57, %v1987_v34 }
 0x2b9   :  { %v2441_v47 = vpop.f32.mrf.mxu1 }
 0x2ba   :  { %2096 = vst [vmem:[#allocation2] sm:$0xff] %v2095_v12 }
 0x2bb   :  { %v2092_v16 = vpop.f32.mrf.mxu1 }
 0x2bd   :  { %v2442_v11 = vpop.f32.mrf.mxu1 }
 0x2be PF:  { %2443 = vmatprep.subr.bf16.mxu0 %v2673_v0  ;;  %v2507_v56 = vld [vmem:[#allocation11 + $0x38] sm:$0xff]   ;;  %v2101_v14 = vlaneseq  ;;  %v2106_v41 = vstv %s2756_s3  ;;  %2463 = vmatprep.subr.bf16.mxu1 %v2673_v0  ;;  %vm2677_vm5 = vmmov 0   ;;  %v2508_v5 = vld [vmem:[#allocation11 + $0x30] sm:$0xff]   ;;  %v2509_v44 = vld [vmem:[#allocation11 + $0x28] sm:$0xff]   ;;  %s2678_s17 = smov [#allocation14]  }
 0x2bf   :  { %2459 = vmatprep.mubr.msk.bf16.mxu0 %vm2677_vm5, %v2673_v0  ;;  %v2367_v63 = vcvt.s32.f32 %v2106_v41  ;;  %2479 = vmatprep.mubr.msk.bf16.mxu1 %vm2677_vm5, %v2673_v0  ;;  %v2515_v17 = vld [vmem:[#allocation13 + $0x38] sm:$0xff]   ;;  %v2510_v24 = vld [vmem:[#allocation11 + $0x20] sm:$0xff]   ;;  %v2516_v21 = vld [vmem:[#allocation13 + $0x30] sm:$0xff]   ;;  %s2345_s18 = sshll.u32 %s2678_s17, 4  ;;  %s2346_s18 = int_to_ptr.vmem [resolvable:$true] %s2345_s18 }
 0x2c0   :  { %2444 = vmatpush3.bf16.msra.mxu0 %v2507_v56  ;;  %v2102_v45 = vshrl.u32 %v2101_v14, 7  ;;  %2464 = vmatpush3.bf16.msra.mxu1 %v2515_v17  ;;  %v2511_v25 = vld [vmem:[#allocation11 + $0x18] sm:$0xff]   ;;  %v2517_v27 = vld [vmem:[#allocation13 + $0x28] sm:$0xff]   ;;  %v2512_v6 = vld [vmem:[#allocation11 + $0x10] sm:$0xff]   ;;  %p2640_p13 = scmp.lt.s32.totalorder %s2346_s18, %s2346_s18 }
 0x2c1   :  { %2445 = vmatprep.subr.bf16.mxu0 %v2673_v0  ;;  %2465 = vmatprep.subr.bf16.mxu1 %v2673_v0  ;;  %v2513_v37 = vld [vmem:[#allocation11 + $0x8] sm:$0xff]   ;;  %v2514_v48 = vld [vmem:[#allocation11] sm:$0xff]   ;;  %v2519_v59 = vld [vmem:[#allocation13 + $0x18] sm:$0xff]  }
 0x2c2   :  { %vm2105_vm8 = vcmp.eq.s32.totalorder %v2102_v45, 0  ;;  %v2110_v26 = vld [vmem:[#allocation2] sm:$0xff]  ;;  %v2518_v15 = vld [vmem:[#allocation13 + $0x20] sm:$0xff]   ;;  %v2520_v52 = vld [vmem:[#allocation13 + $0x10] sm:$0xff]  }
 0x2c3   :  { %v2368_v53 = vsel %vm2105_vm8, %v2367_v63, 0.0  ;;  %v2521_v7 = vld [vmem:[#allocation13 + $0x8] sm:$0xff]   ;;  %v2522_v30 = vld [vmem:[#allocation13] sm:$0xff]  }
 0x2c4   :  { %2446 = vmatpush3.bf16.msra.mxu0 %v2508_v5  ;;  %v2109_v3 = vmax.f32 %v2368_v53, 1.0  ;;  %2466 = vmatpush3.bf16.msra.mxu1 %v2516_v21  ;;  %v2369_v60 = vld [vmem:[%s3892_s6] ss:$0 sm:$0xff]  ;;  %s2635_s6 = scalar_lea.vmem %s2346_s18, 128 }
 0x2c5   :  { %2447 = vmatprep.subr.bf16.mxu0 %v2673_v0  ;;  %2467 = vmatprep.subr.bf16.mxu1 %v2673_v0  ;;  %v2378_v8 = vld [vmem:[%s3894_s8] ss:$0 sm:$0xff]  ;;  %p2636_p12 = scmp.ne.s32.totalorder %s2346_s18, %s2635_s6  ;;  %p2641_p0 = scmp.lt.s32.totalorder %s2635_s6, %s2635_s6 }
 0x2c6   :  { %2523 = vrcp.f32 %v2109_v3 }
 0x2c7   :  { %p2642_p1 = por %p2641_p0, %p2640_p13 }
 0x2c8   :  { %2448 = vmatpush3.bf16.msra.mxu0 %v2509_v44  ;;  %2468 = vmatpush3.bf16.msra.mxu1 %v2517_v27 }
 0x2c9   :  { %2449 = vmatprep.subr.bf16.mxu0 %v2673_v0  ;;  %2469 = vmatprep.subr.bf16.mxu1 %v2673_v0  ;;  %p2643_p2 = pnand %p2642_p1, %p2636_p12 }
 0x2cc   :  { %2450 = vmatpush3.bf16.msra.mxu0 %v2510_v24  ;;  %2470 = vmatpush3.bf16.msra.mxu1 %v2518_v15 }
 0x2cd   :  { %2451 = vmatprep.subr.bf16.mxu0 %v2673_v0  ;;  %2471 = vmatprep.subr.bf16.mxu1 %v2673_v0 }
 0x2d0   :  { %2452 = vmatpush3.bf16.msra.mxu0 %v2511_v25  ;;  %2472 = vmatpush3.bf16.msra.mxu1 %v2519_v59 }
 0x2d1   :  { %2453 = vmatprep.subr.bf16.mxu0 %v2673_v0  ;;  %2473 = vmatprep.subr.bf16.mxu1 %v2673_v0 }
 0x2d3   :  { %v2524_v9 = vpop.eup %2523 }
 0x2d4   :  { %2454 = vmatpush3.bf16.msra.mxu0 %v2512_v6  ;;  %v2112_v40 = vmul.f32 %v2524_v9, %v2110_v26  ;;  %2474 = vmatpush3.bf16.msra.mxu1 %v2520_v52 }
 0x2d5   :  { %2455 = vmatprep.subr.bf16.mxu0 %v2673_v0  ;;  %2475 = vmatprep.subr.bf16.mxu1 %v2673_v0 }
 0x2d6   :  { %v2113_v46 = vpack.c.bf16 %v2112_v40, %v2112_v40 }
 0x2d8   :  { %2456 = vmatpush3.bf16.msra.mxu0 %v2513_v37  ;;  %2476 = vmatpush3.bf16.msra.mxu1 %v2521_v7 }
 0x2d9   :  { %2457 = vmatprep.subr.bf16.mxu0 %v2673_v0  ;;  %2477 = vmatprep.subr.bf16.mxu1 %v2673_v0 }
 0x2dc   :  { %2458 = vmatpush3.bf16.msra.mxu0 %v2514_v48  ;;  %2478 = vmatpush3.bf16.msra.mxu1 %v2522_v30 }
 0x2df   :  { %2460 = vmatmul.mubr.bf16.vlgmr.msra.gmra.mxu0 %v2113_v46 }
 0x39f   :  { %v2219_v22 = vpop.f32.mrf.mxu0 }
 0x3a0   :  { %v2220_v51 = vadd.f32 %v2369_v60, %v2219_v22 }
 0x3a1   :  { %v2461_v62 = vpop.f32.mrf.mxu0 }
 0x3a2   :  { %2525 = vtanh.f32 %v2220_v51 }
 0x3a3   :  { %v2222_v50 = vpop.f32.mrf.mxu0 }
 0x3a5   :  { %v2462_v58 = vpop.f32.mrf.mxu0 }
 0x3af   :  { %v2526_v23 = vpop.eup %2525 }
 0x3b0   :  { %v2226_v55 = vpack.c.bf16 %v2526_v23, %v2526_v23 }
 0x3b2   :  { %2480 = vmatmul.mubr.bf16.vlgmr.msra.gmra.mxu1 %v2226_v55 }
 0x472   :  { %v2332_v0 = vpop.f32.mrf.mxu1 }
 0x473   :  { %v2333_v18 = vadd.f32 %v2378_v8, %v2332_v0 }
 0x474   :  { %v2481_v54 = vpop.f32.mrf.mxu1 }
 0x475   :  { %2338 = vst [vmem:[#allocation14] sm:$0xff] %v2333_v18 }
 0x476   :  { %v2335_v61 = vpop.f32.mrf.mxu1 }
 0x477   :  { %2646 = shalt.err (!%p2643_p2)
}
 0x478   :  { %2348 = dma.vmem_to_hbm [thread:$0]  %s2346_s18, 128, %s3895_s9, [#allocation7]   ;;  %v2482_v29 = vpop.f32.mrf.mxu1 }
 0x479   :  { %2663 = dma.done.wait [#allocation7], 128  }
 0x47a   :  { %2664 = vsyncadd [#allocation7], 4294967168 }
 0x47b   :  { %2352 = vsyncpa [#allocation6], 1 }
 0x47c   :  { %2353 = vsyncpa [#allocation9], 1 }
 0x47d   :  { %2354 = vsyncpa [#allocation12], 1 }
 0x47e   :  { %2355 = vsyncpa [#allocation7], 1 }

</bundles_post_ra>
